<compile_context>
chip_gen: v7x
topology: tpu7x:2x2x1
jax: 0.10.0
libtpu: 0.0.40
codegen_flags: <defaults>
</compile_context>

<pallas_src>
import functools

import jax
import jax.numpy as jnp
from jax.experimental import pallas as pl
from jax.experimental.pallas import tpu as pltpu


def _vmem_specs(n):
    return [pl.BlockSpec(memory_space=pltpu.MemorySpace.VMEM) for _ in range(n)]


# ---------------------------------------------------------------------------
# Fused MyCIGCN forward kernel
# ---------------------------------------------------------------------------
def mycigcn_kernel(n_steps, n_iters,
                   # solute graph
                   su_x_ref, su_w_ref, su_src_ref, su_dst_ref,
                   # solvent graph
                   sv_x_ref, sv_w_ref, sv_src_ref, sv_dst_ref,
                   # membership (len) matrices
                   su_len_t_ref, sv_len_ref,
                   # solute GatherModel params
                   su_lin0_w_ref, su_lin0_b_ref, su_ew1_ref, su_eb1_ref,
                   su_ew2_ref, su_eb2_ref, su_conv_b_ref,
                   su_msg_wm_ref, su_msg_wo_ref, su_msg_b_ref,
                   # solvent GatherModel params
                   sv_lin0_w_ref, sv_lin0_b_ref, sv_ew1_ref, sv_eb1_ref,
                   sv_ew2_ref, sv_eb2_ref, sv_conv_b_ref,
                   sv_msg_wm_ref, sv_msg_wo_ref, sv_msg_b_ref,
                   # Set2Set (solute): LSTM wih split into q-part / readout-part, biases folded
                   s2su_wq_ref, s2su_wr_ref, s2su_whh_ref, s2su_b_ref,
                   # Set2Set (solvent)
                   s2sv_wq_ref, s2sv_wr_ref, s2sv_whh_ref, s2sv_b_ref,
                   # MLP head: fc1 weight pre-split along its 4 input blocks
                   fc1_wqa_ref, fc1_wra_ref, fc1_wqb_ref, fc1_wrb_ref, fc1_b_ref,
                   fc2_w_ref, fc2_b_ref,
                   o_ref):

    # ------------------------- GatherModel (shared body) -------------------
    def gather(nfeat, efeat, src, dst,
               lin0_w, lin0_b, ew1, eb1, ew2, eb2, conv_b, wm, wo, mb):
        d = nfeat.shape[1]
        # relu(lin0(n_feat))
        out = jnp.maximum(
            jnp.dot(nfeat, lin0_w, preferred_element_type=jnp.float32) + lin0_b, 0.0)
        # edge network: Linear -> ReLU -> Linear  -> per-edge (d, d) weights (flattened)
        eh = jnp.maximum(
            jnp.dot(efeat, ew1, preferred_element_type=jnp.float32) + eb1, 0.0)
        wfeat = jnp.dot(eh, ew2, preferred_element_type=jnp.float32) + eb2     # (E, d*d)

        # statically unrolled message-passing loop (n_steps is a Python int)
        for _ in range(n_steps):
            hsrc = jnp.dot(src, out, preferred_element_type=jnp.float32)       # (E, d)
            # per-edge message m_e = h_src[e] @ reshape(wfeat[e], (d, d));
            # start from the first term (no zeros init).
            # TODO(synk): for larger d, switch to a single einsum('ei,eij->ej') contraction.
            msg = hsrc[:, 0:1] * wfeat[:, 0:d]
            for i in range(1, d):
                msg = msg + hsrc[:, i:i + 1] * wfeat[:, i * d:(i + 1) * d]
            agg = jnp.dot(dst, msg, preferred_element_type=jnp.float32)        # sum over incoming edges
            m = jnp.maximum(agg + out + conv_b, 0.0)    # relu(NNConv: sum-aggr + identity residual + bias)
            # message_layer(cat([m, out], dim=1)) with the weight pre-split into wm / wo
            out = (jnp.dot(m, wm, preferred_element_type=jnp.float32)
                   + jnp.dot(out, wo, preferred_element_type=jnp.float32) + mb)
        return out + nfeat                               # out + init

    su = gather(su_x_ref[...], su_w_ref[...], su_src_ref[...], su_dst_ref[...],
                su_lin0_w_ref[...], su_lin0_b_ref[...],
                su_ew1_ref[...], su_eb1_ref[...], su_ew2_ref[...], su_eb2_ref[...],
                su_conv_b_ref[...], su_msg_wm_ref[...], su_msg_wo_ref[...], su_msg_b_ref[...])
    sv = gather(sv_x_ref[...], sv_w_ref[...], sv_src_ref[...], sv_dst_ref[...],
                sv_lin0_w_ref[...], sv_lin0_b_ref[...],
                sv_ew1_ref[...], sv_eb1_ref[...], sv_ew2_ref[...], sv_eb2_ref[...],
                sv_conv_b_ref[...], sv_msg_wm_ref[...], sv_msg_wo_ref[...], sv_msg_b_ref[...])

    # ------------------------- interaction map ------------------------------
    len_map = jnp.dot(su_len_t_ref[...], sv_len_ref[...],
                      preferred_element_type=jnp.float32)                      # (N1, N2)
    inter = jnp.tanh(jnp.einsum('nd,md->nm', su, sv,
                                preferred_element_type=jnp.float32)) * len_map
    solute_prime = jnp.dot(inter, sv, preferred_element_type=jnp.float32)      # (N1, d)
    solvent_prime = jnp.einsum('nm,nd->md', inter, su,
                               preferred_element_type=jnp.float32)             # (N2, d)

    su_cat = jnp.concatenate([su, solute_prime], axis=1)    # (N1, 2d)  (once, outside hot loops)
    sv_cat = jnp.concatenate([sv, solvent_prime], axis=1)   # (N2, 2d)

    # ------------------------- Set2Set (batch_size = 1) ---------------------
    def set2set(feat, wq, wr, whh, b):
        hid = feat.shape[1]
        h = jnp.zeros((1, hid), jnp.float32)
        c = jnp.zeros((1, hid), jnp.float32)
        q = jnp.zeros((1, hid), jnp.float32)        # q-part of q_star
        readout = jnp.zeros((1, hid), jnp.float32)  # readout-part of q_star
        for _ in range(n_iters):                    # statically unrolled (n_iters=2)
            gates = (jnp.dot(q, wq, preferred_element_type=jnp.float32)
                     + jnp.dot(readout, wr, preferred_element_type=jnp.float32)
                     + jnp.dot(h, whh, preferred_element_type=jnp.float32) + b)   # (1, 4*hid)
            i_g = jax.nn.sigmoid(gates[:, 0:hid])
            f_g = jax.nn.sigmoid(gates[:, hid:2 * hid])
            g_g = jnp.tanh(gates[:, 2 * hid:3 * hid])
            o_g = jax.nn.sigmoid(gates[:, 3 * hid:4 * hid])
            c = f_g * c + i_g * g_g
            h = o_g * jnp.tanh(c)
            q = h                                                        # (1, hid)
            e = jnp.sum(feat * q, axis=-1, keepdims=True)                # (N, 1)
            e = e - jnp.max(e, axis=0, keepdims=True)
            alpha = jnp.exp(e)
            alpha = alpha / jnp.sum(alpha, axis=0, keepdims=True)        # softmax over nodes
            readout = jnp.sum(feat * alpha, axis=0, keepdims=True)       # (1, hid)
        return q, readout                             # q_star = [q, readout], never concatenated

    q_su, r_su = set2set(su_cat, s2su_wq_ref[...], s2su_wr_ref[...],
                         s2su_whh_ref[...], s2su_b_ref[...])
    q_sv, r_sv = set2set(sv_cat, s2sv_wq_ref[...], s2sv_wr_ref[...],
                         s2sv_whh_ref[...], s2sv_b_ref[...])

    # ------------------------- MLP head (fc1 pre-split) ---------------------
    hdn = jnp.maximum(
        jnp.dot(q_su, fc1_wqa_ref[...], preferred_element_type=jnp.float32)
        + jnp.dot(r_su, fc1_wra_ref[...], preferred_element_type=jnp.float32)
        + jnp.dot(q_sv, fc1_wqb_ref[...], preferred_element_type=jnp.float32)
        + jnp.dot(r_sv, fc1_wrb_ref[...], preferred_element_type=jnp.float32)
        + fc1_b_ref[...], 0.0)
    o_ref[...] = jnp.dot(hdn, fc2_w_ref[...], preferred_element_type=jnp.float32) + fc2_b_ref[...]


# ---------------------------------------------------------------------------
# Wrapper: one fused pallas_call
# ---------------------------------------------------------------------------
def mycigcn_forward(su_x, su_w, su_src, su_dst,
                    sv_x, sv_w, sv_src, sv_dst,
                    su_len, sv_len,
                    su_gather_p, sv_gather_p,
                    s2s_su, s2s_sv,
                    fc1_w, fc1_b, fc2_w, fc2_b,
                    n_steps, n_iters=2):
    hid = 2 * su_x.shape[1]   # Set2Set input dim = 2 * node_hidden_dim

    def gp(p):
        return (p['lin0_w'], p['lin0_b'], p['ew1'], p['eb1'], p['ew2'], p['eb2'],
                p['conv_b'], p['msg_wm'], p['msg_wo'], p['msg_b'])

    def s2s(p):
        # wih is stored transposed (2*hid, 4*hid); split into q-part / readout-part,
        # fold the two LSTM biases into one.
        return (p['wih'][:hid, :], p['wih'][hid:, :], p['whh'], p['bih'] + p['bhh'])

    # fc1 weight stored transposed (32, 16); split along its 4 input blocks
    fc1_split = (fc1_w[0 * hid:1 * hid, :], fc1_w[1 * hid:2 * hid, :],
                 fc1_w[2 * hid:3 * hid, :], fc1_w[3 * hid:4 * hid, :])

    args = ((su_x, su_w, su_src, su_dst,
             sv_x, sv_w, sv_src, sv_dst,
             jnp.transpose(su_len), sv_len)
            + gp(su_gather_p) + gp(sv_gather_p)
            + s2s(s2s_su) + s2s(s2s_sv)
            + fc1_split + (fc1_b, fc2_w, fc2_b))

    kern = functools.partial(mycigcn_kernel, n_steps, n_iters)
    return pl.pallas_call(
        kern,
        out_shape=jax.ShapeDtypeStruct((1, 1), jnp.float32),
        in_specs=_vmem_specs(len(args)),
        out_specs=pl.BlockSpec(memory_space=pltpu.MemorySpace.VMEM),
    )(*args)


# ---------------------------------------------------------------------------
# Parameter / input construction (deterministic, synthetic)
# ---------------------------------------------------------------------------
def init_gather_params(key, d, de, deh, scale=0.2):
    ks = jax.random.split(key, 10)
    nrm = lambda k, s: (jax.random.normal(k, s, jnp.float32) * scale)
    return dict(
        lin0_w=nrm(ks[0], (d, d)),          # stored transposed: (in, out)
        lin0_b=nrm(ks[1], (1, d)),
        ew1=nrm(ks[2], (de, deh)),
        eb1=nrm(ks[3], (1, deh)),
        ew2=nrm(ks[4], (deh, d * d)),
        eb2=nrm(ks[5], (1, d * d)),
        conv_b=nrm(ks[6], (1, d)),
        msg_wm=nrm(ks[7], (d, d)),          # message_layer weight, columns for `m`
        msg_wo=nrm(ks[8], (d, d)),          # message_layer weight, columns for `out`
        msg_b=nrm(ks[9], (1, d)),
    )


def init_set2set_params(key, in_dim, scale=0.2):
    # LSTM(input = 2*in_dim, hidden = in_dim, layers = 1); weights stored transposed.
    ks = jax.random.split(key, 4)
    nrm = lambda k, s: (jax.random.normal(k, s, jnp.float32) * scale)
    return dict(
        wih=nrm(ks[0], (2 * in_dim, 4 * in_dim)),
        whh=nrm(ks[1], (in_dim, 4 * in_dim)),
        bih=nrm(ks[2], (1, 4 * in_dim)),
        bhh=nrm(ks[3], (1, 4 * in_dim)),
    )


def ring_graph(n):
    src, dst = [], []
    for i in range(n):
        src += [i, (i + 1) % n]
        dst += [(i + 1) % n, i]
    src = jnp.array(src, jnp.int32)
    dst = jnp.array(dst, jnp.int32)
    src_onehot = jax.nn.one_hot(src, n, dtype=jnp.float32)                  # (E, N)
    dst_onehot = jnp.transpose(jax.nn.one_hot(dst, n, dtype=jnp.float32))   # (N, E)
    return src_onehot, dst_onehot


if __name__ == "__main__":
    key = jax.random.PRNGKey(0)

    # Model hyper-parameters (constrained by the reference module, see header comment).
    node_input_dim = 4
    node_hidden_dim = 4
    edge_input_dim = 6
    edge_hidden_dim = 8
    num_step_message_passing = 3

    n_solute, n_solvent = 6, 5
    e_solute, e_solvent = 2 * n_solute, 2 * n_solvent

    ks = jax.random.split(key, 10)

    # graph node / edge features
    solute_x = jax.random.normal(ks[0], (n_solute, node_input_dim), jnp.float32)
    solute_w = jax.random.normal(ks[1], (e_solute, edge_input_dim), jnp.float32)
    solvent_x = jax.random.normal(ks[2], (n_solvent, node_input_dim), jnp.float32)
    solvent_w = jax.random.normal(ks[3], (e_solvent, edge_input_dim), jnp.float32)

    su_src, su_dst = ring_graph(n_solute)
    sv_src, sv_dst = ring_graph(n_solvent)

    # single graph per side -> membership (len) matrices are all ones
    solute_len_matrix = jnp.ones((1, n_solute), jnp.float32)
    solvent_len_matrix = jnp.ones((1, n_solvent), jnp.float32)

    # parameters
    solute_gather_p = init_gather_params(ks[4], node_hidden_dim, edge_input_dim, edge_hidden_dim)
    solvent_gather_p = init_gather_params(ks[5], node_hidden_dim, edge_input_dim, edge_hidden_dim)
    s2s_solute_p = init_set2set_params(ks[6], 2 * node_hidden_dim)
    s2s_solvent_p = init_set2set_params(ks[7], 2 * node_hidden_dim)
    fc1_w = jax.random.normal(ks[8], (32, 16), jnp.float32) * 0.2   # transposed (in, out)
    fc1_b = jnp.zeros((1, 16), jnp.float32)
    fc2_w = jax.random.normal(ks[9], (16, 1), jnp.float32) * 0.2
    fc2_b = jnp.zeros((1, 1), jnp.float32)

    # --- fused forward pass (single kernel launch) ---
    pred = mycigcn_forward(solute_x, solute_w, su_src, su_dst,
                           solvent_x, solvent_w, sv_src, sv_dst,
                           solute_len_matrix, solvent_len_matrix,
                           solute_gather_p, solvent_gather_p,
                           s2s_solute_p, s2s_solvent_p,
                           fc1_w, fc1_b, fc2_w, fc2_b,
                           n_steps=num_step_message_passing, n_iters=2)

    pred = jax.block_until_ready(pred)
    assert pred.shape == (1, 1) and pred.dtype == jnp.float32
    print("KERNEL_OK")
</pallas_src>

<mosaic_0001>
module attributes {stable_mosaic.version = 11 : i64} {
  func.func @mycigcn_kernel(%arg0: memref<6x4xf32, #tpu.memory_space<vmem>>, %arg1: memref<12x6xf32, #tpu.memory_space<vmem>>, %arg2: memref<12x6xf32, #tpu.memory_space<vmem>>, %arg3: memref<6x12xf32, #tpu.memory_space<vmem>>, %arg4: memref<5x4xf32, #tpu.memory_space<vmem>>, %arg5: memref<10x6xf32, #tpu.memory_space<vmem>>, %arg6: memref<10x5xf32, #tpu.memory_space<vmem>>, %arg7: memref<5x10xf32, #tpu.memory_space<vmem>>, %arg8: memref<6x1xf32, #tpu.memory_space<vmem>>, %arg9: memref<1x5xf32, #tpu.memory_space<vmem>>, %arg10: memref<4x4xf32, #tpu.memory_space<vmem>>, %arg11: memref<1x4xf32, #tpu.memory_space<vmem>>, %arg12: memref<6x8xf32, #tpu.memory_space<vmem>>, %arg13: memref<1x8xf32, #tpu.memory_space<vmem>>, %arg14: memref<8x16xf32, #tpu.memory_space<vmem>>, %arg15: memref<1x16xf32, #tpu.memory_space<vmem>>, %arg16: memref<1x4xf32, #tpu.memory_space<vmem>>, %arg17: memref<4x4xf32, #tpu.memory_space<vmem>>, %arg18: memref<4x4xf32, #tpu.memory_space<vmem>>, %arg19: memref<1x4xf32, #tpu.memory_space<vmem>>, %arg20: memref<4x4xf32, #tpu.memory_space<vmem>>, %arg21: memref<1x4xf32, #tpu.memory_space<vmem>>, %arg22: memref<6x8xf32, #tpu.memory_space<vmem>>, %arg23: memref<1x8xf32, #tpu.memory_space<vmem>>, %arg24: memref<8x16xf32, #tpu.memory_space<vmem>>, %arg25: memref<1x16xf32, #tpu.memory_space<vmem>>, %arg26: memref<1x4xf32, #tpu.memory_space<vmem>>, %arg27: memref<4x4xf32, #tpu.memory_space<vmem>>, %arg28: memref<4x4xf32, #tpu.memory_space<vmem>>, %arg29: memref<1x4xf32, #tpu.memory_space<vmem>>, %arg30: memref<8x32xf32, #tpu.memory_space<vmem>>, %arg31: memref<8x32xf32, #tpu.memory_space<vmem>>, %arg32: memref<8x32xf32, #tpu.memory_space<vmem>>, %arg33: memref<1x32xf32, #tpu.memory_space<vmem>>, %arg34: memref<8x32xf32, #tpu.memory_space<vmem>>, %arg35: memref<8x32xf32, #tpu.memory_space<vmem>>, %arg36: memref<8x32xf32, #tpu.memory_space<vmem>>, %arg37: memref<1x32xf32, #tpu.memory_space<vmem>>, %arg38: memref<8x16xf32, #tpu.memory_space<vmem>>, %arg39: memref<8x16xf32, #tpu.memory_space<vmem>>, %arg40: memref<8x16xf32, #tpu.memory_space<vmem>>, %arg41: memref<8x16xf32, #tpu.memory_space<vmem>>, %arg42: memref<1x16xf32, #tpu.memory_space<vmem>>, %arg43: memref<16x1xf32, #tpu.memory_space<vmem>>, %arg44: memref<1x1xf32, #tpu.memory_space<vmem>>, %arg45: memref<1x1xf32, #tpu.memory_space<vmem>>) attributes {dimension_semantics = [], scalar_prefetch = 0 : i64, scratch_operands = 0 : i64, tpu.core_type = #tpu.core_type<tc>} {
    %c0 = arith.constant 0 : index
    %c0_0 = arith.constant 0 : index
    %0 = vector.load %arg0[%c0, %c0_0] : memref<6x4xf32, #tpu.memory_space<vmem>>, vector<6x4xf32>
    %c0_1 = arith.constant 0 : index
    %c0_2 = arith.constant 0 : index
    %1 = vector.load %arg1[%c0_1, %c0_2] : memref<12x6xf32, #tpu.memory_space<vmem>>, vector<12x6xf32>
    %c0_3 = arith.constant 0 : index
    %c0_4 = arith.constant 0 : index
    %2 = vector.load %arg2[%c0_3, %c0_4] : memref<12x6xf32, #tpu.memory_space<vmem>>, vector<12x6xf32>
    %c0_5 = arith.constant 0 : index
    %c0_6 = arith.constant 0 : index
    %3 = vector.load %arg3[%c0_5, %c0_6] : memref<6x12xf32, #tpu.memory_space<vmem>>, vector<6x12xf32>
    %c0_7 = arith.constant 0 : index
    %c0_8 = arith.constant 0 : index
    %4 = vector.load %arg10[%c0_7, %c0_8] : memref<4x4xf32, #tpu.memory_space<vmem>>, vector<4x4xf32>
    %c0_9 = arith.constant 0 : index
    %c0_10 = arith.constant 0 : index
    %5 = vector.load %arg11[%c0_9, %c0_10] : memref<1x4xf32, #tpu.memory_space<vmem>>, vector<1x4xf32>
    %c0_11 = arith.constant 0 : index
    %c0_12 = arith.constant 0 : index
    %6 = vector.load %arg12[%c0_11, %c0_12] : memref<6x8xf32, #tpu.memory_space<vmem>>, vector<6x8xf32>
    %c0_13 = arith.constant 0 : index
    %c0_14 = arith.constant 0 : index
    %7 = vector.load %arg13[%c0_13, %c0_14] : memref<1x8xf32, #tpu.memory_space<vmem>>, vector<1x8xf32>
    %c0_15 = arith.constant 0 : index
    %c0_16 = arith.constant 0 : index
    %8 = vector.load %arg14[%c0_15, %c0_16] : memref<8x16xf32, #tpu.memory_space<vmem>>, vector<8x16xf32>
    %c0_17 = arith.constant 0 : index
    %c0_18 = arith.constant 0 : index
    %9 = vector.load %arg15[%c0_17, %c0_18] : memref<1x16xf32, #tpu.memory_space<vmem>>, vector<1x16xf32>
    %c0_19 = arith.constant 0 : index
    %c0_20 = arith.constant 0 : index
    %10 = vector.load %arg16[%c0_19, %c0_20] : memref<1x4xf32, #tpu.memory_space<vmem>>, vector<1x4xf32>
    %c0_21 = arith.constant 0 : index
    %c0_22 = arith.constant 0 : index
    %11 = vector.load %arg17[%c0_21, %c0_22] : memref<4x4xf32, #tpu.memory_space<vmem>>, vector<4x4xf32>
    %c0_23 = arith.constant 0 : index
    %c0_24 = arith.constant 0 : index
    %12 = vector.load %arg18[%c0_23, %c0_24] : memref<4x4xf32, #tpu.memory_space<vmem>>, vector<4x4xf32>
    %c0_25 = arith.constant 0 : index
    %c0_26 = arith.constant 0 : index
    %13 = vector.load %arg19[%c0_25, %c0_26] : memref<1x4xf32, #tpu.memory_space<vmem>>, vector<1x4xf32>
    %cst = arith.constant dense<0.000000e+00> : vector<6x4xf32>
    %14 = tpu.matmul %0, %4, %cst {dimension_numbers = #tpu.dot_dimension_numbers<[1], [0], [0], [1], [0, 0, 1, 1], [], []>} : vector<6x4xf32>, vector<4x4xf32>, vector<6x4xf32> -> vector<6x4xf32>
    %15 = vector.broadcast %5 : vector<1x4xf32> to vector<6x4xf32>
    %16 = arith.addf %14, %15 : vector<6x4xf32>
    %cst_27 = arith.constant 0.000000e+00 : f32
    %17 = vector.broadcast %cst_27 : f32 to vector<6x4xf32>
    %18 = arith.maximumf %16, %17 : vector<6x4xf32>
    %cst_28 = arith.constant dense<0.000000e+00> : vector<12x8xf32>
    %19 = tpu.matmul %1, %6, %cst_28 {dimension_numbers = #tpu.dot_dimension_numbers<[1], [0], [0], [1], [0, 0, 1, 1], [], []>} : vector<12x6xf32>, vector<6x8xf32>, vector<12x8xf32> -> vector<12x8xf32>
    %20 = vector.broadcast %7 : vector<1x8xf32> to vector<12x8xf32>
    %21 = arith.addf %19, %20 : vector<12x8xf32>
    %cst_29 = arith.constant 0.000000e+00 : f32
    %22 = vector.broadcast %cst_29 : f32 to vector<12x8xf32>
    %23 = arith.maximumf %21, %22 : vector<12x8xf32>
    %cst_30 = arith.constant dense<0.000000e+00> : vector<12x16xf32>
    %24 = tpu.matmul %23, %8, %cst_30 {dimension_numbers = #tpu.dot_dimension_numbers<[1], [0], [0], [1], [0, 0, 1, 1], [], []>} : vector<12x8xf32>, vector<8x16xf32>, vector<12x16xf32> -> vector<12x16xf32>
    %25 = vector.broadcast %9 : vector<1x16xf32> to vector<12x16xf32>
    %26 = arith.addf %24, %25 : vector<12x16xf32>
    %cst_31 = arith.constant dense<0.000000e+00> : vector<12x4xf32>
    %27 = tpu.matmul %2, %18, %cst_31 {dimension_numbers = #tpu.dot_dimension_numbers<[1], [0], [0], [1], [0, 0, 1, 1], [], []>} : vector<12x6xf32>, vector<6x4xf32>, vector<12x4xf32> -> vector<12x4xf32>
    %28 = vector.extract_strided_slice %27 {offsets = [0, 0], sizes = [12, 1], strides = [1, 1]} : vector<12x4xf32> to vector<12x1xf32>
    %29 = vector.extract_strided_slice %26 {offsets = [0, 0], sizes = [12, 4], strides = [1, 1]} : vector<12x16xf32> to vector<12x4xf32>
    %30 = vector.broadcast %28 : vector<12x1xf32> to vector<12x4xf32>
    %31 = arith.mulf %30, %29 : vector<12x4xf32>
    %32 = vector.extract_strided_slice %27 {offsets = [0, 1], sizes = [12, 1], strides = [1, 1]} : vector<12x4xf32> to vector<12x1xf32>
    %33 = vector.extract_strided_slice %26 {offsets = [0, 4], sizes = [12, 4], strides = [1, 1]} : vector<12x16xf32> to vector<12x4xf32>
    %34 = vector.broadcast %32 : vector<12x1xf32> to vector<12x4xf32>
    %35 = arith.mulf %34, %33 : vector<12x4xf32>
    %36 = arith.addf %31, %35 : vector<12x4xf32>
    %37 = vector.extract_strided_slice %27 {offsets = [0, 2], sizes = [12, 1], strides = [1, 1]} : vector<12x4xf32> to vector<12x1xf32>
    %38 = vector.extract_strided_slice %26 {offsets = [0, 8], sizes = [12, 4], strides = [1, 1]} : vector<12x16xf32> to vector<12x4xf32>
    %39 = vector.broadcast %37 : vector<12x1xf32> to vector<12x4xf32>
    %40 = arith.mulf %39, %38 : vector<12x4xf32>
    %41 = arith.addf %36, %40 : vector<12x4xf32>
    %42 = vector.extract_strided_slice %27 {offsets = [0, 3], sizes = [12, 1], strides = [1, 1]} : vector<12x4xf32> to vector<12x1xf32>
    %43 = vector.extract_strided_slice %26 {offsets = [0, 12], sizes = [12, 4], strides = [1, 1]} : vector<12x16xf32> to vector<12x4xf32>
    %44 = vector.broadcast %42 : vector<12x1xf32> to vector<12x4xf32>
    %45 = arith.mulf %44, %43 : vector<12x4xf32>
    %46 = arith.addf %41, %45 : vector<12x4xf32>
    %cst_32 = arith.constant dense<0.000000e+00> : vector<6x4xf32>
    %47 = tpu.matmul %3, %46, %cst_32 {dimension_numbers = #tpu.dot_dimension_numbers<[1], [0], [0], [1], [0, 0, 1, 1], [], []>} : vector<6x12xf32>, vector<12x4xf32>, vector<6x4xf32> -> vector<6x4xf32>
    %48 = arith.addf %47, %18 : vector<6x4xf32>
    %49 = vector.broadcast %10 : vector<1x4xf32> to vector<6x4xf32>
    %50 = arith.addf %48, %49 : vector<6x4xf32>
    %cst_33 = arith.constant 0.000000e+00 : f32
    %51 = vector.broadcast %cst_33 : f32 to vector<6x4xf32>
    %52 = arith.maximumf %50, %51 : vector<6x4xf32>
    %cst_34 = arith.constant dense<0.000000e+00> : vector<6x4xf32>
    %53 = tpu.matmul %52, %11, %cst_34 {dimension_numbers = #tpu.dot_dimension_numbers<[1], [0], [0], [1], [0, 0, 1, 1], [], []>} : vector<6x4xf32>, vector<4x4xf32>, vector<6x4xf32> -> vector<6x4xf32>
    %cst_35 = arith.constant dense<0.000000e+00> : vector<6x4xf32>
    %54 = tpu.matmul %18, %12, %cst_35 {dimension_numbers = #tpu.dot_dimension_numbers<[1], [0], [0], [1], [0, 0, 1, 1], [], []>} : vector<6x4xf32>, vector<4x4xf32>, vector<6x4xf32> -> vector<6x4xf32>
    %55 = arith.addf %53, %54 : vector<6x4xf32>
    %56 = vector.broadcast %13 : vector<1x4xf32> to vector<6x4xf32>
    %57 = arith.addf %55, %56 : vector<6x4xf32>
    %cst_36 = arith.constant dense<0.000000e+00> : vector<12x4xf32>
    %58 = tpu.matmul %2, %57, %cst_36 {dimension_numbers = #tpu.dot_dimension_numbers<[1], [0], [0], [1], [0, 0, 1, 1], [], []>} : vector<12x6xf32>, vector<6x4xf32>, vector<12x4xf32> -> vector<12x4xf32>
    %59 = vector.extract_strided_slice %58 {offsets = [0, 0], sizes = [12, 1], strides = [1, 1]} : vector<12x4xf32> to vector<12x1xf32>
    %60 = vector.extract_strided_slice %26 {offsets = [0, 0], sizes = [12, 4], strides = [1, 1]} : vector<12x16xf32> to vector<12x4xf32>
    %61 = vector.broadcast %59 : vector<12x1xf32> to vector<12x4xf32>
    %62 = arith.mulf %61, %60 : vector<12x4xf32>
    %63 = vector.extract_strided_slice %58 {offsets = [0, 1], sizes = [12, 1], strides = [1, 1]} : vector<12x4xf32> to vector<12x1xf32>
    %64 = vector.extract_strided_slice %26 {offsets = [0, 4], sizes = [12, 4], strides = [1, 1]} : vector<12x16xf32> to vector<12x4xf32>
    %65 = vector.broadcast %63 : vector<12x1xf32> to vector<12x4xf32>
    %66 = arith.mulf %65, %64 : vector<12x4xf32>
    %67 = arith.addf %62, %66 : vector<12x4xf32>
    %68 = vector.extract_strided_slice %58 {offsets = [0, 2], sizes = [12, 1], strides = [1, 1]} : vector<12x4xf32> to vector<12x1xf32>
    %69 = vector.extract_strided_slice %26 {offsets = [0, 8], sizes = [12, 4], strides = [1, 1]} : vector<12x16xf32> to vector<12x4xf32>
    %70 = vector.broadcast %68 : vector<12x1xf32> to vector<12x4xf32>
    %71 = arith.mulf %70, %69 : vector<12x4xf32>
    %72 = arith.addf %67, %71 : vector<12x4xf32>
    %73 = vector.extract_strided_slice %58 {offsets = [0, 3], sizes = [12, 1], strides = [1, 1]} : vector<12x4xf32> to vector<12x1xf32>
    %74 = vector.extract_strided_slice %26 {offsets = [0, 12], sizes = [12, 4], strides = [1, 1]} : vector<12x16xf32> to vector<12x4xf32>
    %75 = vector.broadcast %73 : vector<12x1xf32> to vector<12x4xf32>
    %76 = arith.mulf %75, %74 : vector<12x4xf32>
    %77 = arith.addf %72, %76 : vector<12x4xf32>
    %cst_37 = arith.constant dense<0.000000e+00> : vector<6x4xf32>
    %78 = tpu.matmul %3, %77, %cst_37 {dimension_numbers = #tpu.dot_dimension_numbers<[1], [0], [0], [1], [0, 0, 1, 1], [], []>} : vector<6x12xf32>, vector<12x4xf32>, vector<6x4xf32> -> vector<6x4xf32>
    %79 = arith.addf %78, %57 : vector<6x4xf32>
    %80 = vector.broadcast %10 : vector<1x4xf32> to vector<6x4xf32>
    %81 = arith.addf %79, %80 : vector<6x4xf32>
    %cst_38 = arith.constant 0.000000e+00 : f32
    %82 = vector.broadcast %cst_38 : f32 to vector<6x4xf32>
    %83 = arith.maximumf %81, %82 : vector<6x4xf32>
    %cst_39 = arith.constant dense<0.000000e+00> : vector<6x4xf32>
    %84 = tpu.matmul %83, %11, %cst_39 {dimension_numbers = #tpu.dot_dimension_numbers<[1], [0], [0], [1], [0, 0, 1, 1], [], []>} : vector<6x4xf32>, vector<4x4xf32>, vector<6x4xf32> -> vector<6x4xf32>
    %cst_40 = arith.constant dense<0.000000e+00> : vector<6x4xf32>
    %85 = tpu.matmul %57, %12, %cst_40 {dimension_numbers = #tpu.dot_dimension_numbers<[1], [0], [0], [1], [0, 0, 1, 1], [], []>} : vector<6x4xf32>, vector<4x4xf32>, vector<6x4xf32> -> vector<6x4xf32>
    %86 = arith.addf %84, %85 : vector<6x4xf32>
    %87 = vector.broadcast %13 : vector<1x4xf32> to vector<6x4xf32>
    %88 = arith.addf %86, %87 : vector<6x4xf32>
    %cst_41 = arith.constant dense<0.000000e+00> : vector<12x4xf32>
    %89 = tpu.matmul %2, %88, %cst_41 {dimension_numbers = #tpu.dot_dimension_numbers<[1], [0], [0], [1], [0, 0, 1, 1], [], []>} : vector<12x6xf32>, vector<6x4xf32>, vector<12x4xf32> -> vector<12x4xf32>
    %90 = vector.extract_strided_slice %89 {offsets = [0, 0], sizes = [12, 1], strides = [1, 1]} : vector<12x4xf32> to vector<12x1xf32>
    %91 = vector.extract_strided_slice %26 {offsets = [0, 0], sizes = [12, 4], strides = [1, 1]} : vector<12x16xf32> to vector<12x4xf32>
    %92 = vector.broadcast %90 : vector<12x1xf32> to vector<12x4xf32>
    %93 = arith.mulf %92, %91 : vector<12x4xf32>
    %94 = vector.extract_strided_slice %89 {offsets = [0, 1], sizes = [12, 1], strides = [1, 1]} : vector<12x4xf32> to vector<12x1xf32>
    %95 = vector.extract_strided_slice %26 {offsets = [0, 4], sizes = [12, 4], strides = [1, 1]} : vector<12x16xf32> to vector<12x4xf32>
    %96 = vector.broadcast %94 : vector<12x1xf32> to vector<12x4xf32>
    %97 = arith.mulf %96, %95 : vector<12x4xf32>
    %98 = arith.addf %93, %97 : vector<12x4xf32>
    %99 = vector.extract_strided_slice %89 {offsets = [0, 2], sizes = [12, 1], strides = [1, 1]} : vector<12x4xf32> to vector<12x1xf32>
    %100 = vector.extract_strided_slice %26 {offsets = [0, 8], sizes = [12, 4], strides = [1, 1]} : vector<12x16xf32> to vector<12x4xf32>
    %101 = vector.broadcast %99 : vector<12x1xf32> to vector<12x4xf32>
    %102 = arith.mulf %101, %100 : vector<12x4xf32>
    %103 = arith.addf %98, %102 : vector<12x4xf32>
    %104 = vector.extract_strided_slice %89 {offsets = [0, 3], sizes = [12, 1], strides = [1, 1]} : vector<12x4xf32> to vector<12x1xf32>
    %105 = vector.extract_strided_slice %26 {offsets = [0, 12], sizes = [12, 4], strides = [1, 1]} : vector<12x16xf32> to vector<12x4xf32>
    %106 = vector.broadcast %104 : vector<12x1xf32> to vector<12x4xf32>
    %107 = arith.mulf %106, %105 : vector<12x4xf32>
    %108 = arith.addf %103, %107 : vector<12x4xf32>
    %cst_42 = arith.constant dense<0.000000e+00> : vector<6x4xf32>
    %109 = tpu.matmul %3, %108, %cst_42 {dimension_numbers = #tpu.dot_dimension_numbers<[1], [0], [0], [1], [0, 0, 1, 1], [], []>} : vector<6x12xf32>, vector<12x4xf32>, vector<6x4xf32> -> vector<6x4xf32>
    %110 = arith.addf %109, %88 : vector<6x4xf32>
    %111 = vector.broadcast %10 : vector<1x4xf32> to vector<6x4xf32>
    %112 = arith.addf %110, %111 : vector<6x4xf32>
    %cst_43 = arith.constant 0.000000e+00 : f32
    %113 = vector.broadcast %cst_43 : f32 to vector<6x4xf32>
    %114 = arith.maximumf %112, %113 : vector<6x4xf32>
    %cst_44 = arith.constant dense<0.000000e+00> : vector<6x4xf32>
    %115 = tpu.matmul %114, %11, %cst_44 {dimension_numbers = #tpu.dot_dimension_numbers<[1], [0], [0], [1], [0, 0, 1, 1], [], []>} : vector<6x4xf32>, vector<4x4xf32>, vector<6x4xf32> -> vector<6x4xf32>
    %cst_45 = arith.constant dense<0.000000e+00> : vector<6x4xf32>
    %116 = tpu.matmul %88, %12, %cst_45 {dimension_numbers = #tpu.dot_dimension_numbers<[1], [0], [0], [1], [0, 0, 1, 1], [], []>} : vector<6x4xf32>, vector<4x4xf32>, vector<6x4xf32> -> vector<6x4xf32>
    %117 = arith.addf %115, %116 : vector<6x4xf32>
    %118 = vector.broadcast %13 : vector<1x4xf32> to vector<6x4xf32>
    %119 = arith.addf %117, %118 : vector<6x4xf32>
    %120 = arith.addf %119, %0 : vector<6x4xf32>
    %c0_46 = arith.constant 0 : index
    %c0_47 = arith.constant 0 : index
    %121 = vector.load %arg4[%c0_46, %c0_47] : memref<5x4xf32, #tpu.memory_space<vmem>>, vector<5x4xf32>
    %c0_48 = arith.constant 0 : index
    %c0_49 = arith.constant 0 : index
    %122 = vector.load %arg5[%c0_48, %c0_49] : memref<10x6xf32, #tpu.memory_space<vmem>>, vector<10x6xf32>
    %c0_50 = arith.constant 0 : index
    %c0_51 = arith.constant 0 : index
    %123 = vector.load %arg6[%c0_50, %c0_51] : memref<10x5xf32, #tpu.memory_space<vmem>>, vector<10x5xf32>
    %c0_52 = arith.constant 0 : index
    %c0_53 = arith.constant 0 : index
    %124 = vector.load %arg7[%c0_52, %c0_53] : memref<5x10xf32, #tpu.memory_space<vmem>>, vector<5x10xf32>
    %c0_54 = arith.constant 0 : index
    %c0_55 = arith.constant 0 : index
    %125 = vector.load %arg20[%c0_54, %c0_55] : memref<4x4xf32, #tpu.memory_space<vmem>>, vector<4x4xf32>
    %c0_56 = arith.constant 0 : index
    %c0_57 = arith.constant 0 : index
    %126 = vector.load %arg21[%c0_56, %c0_57] : memref<1x4xf32, #tpu.memory_space<vmem>>, vector<1x4xf32>
    %c0_58 = arith.constant 0 : index
    %c0_59 = arith.constant 0 : index
    %127 = vector.load %arg22[%c0_58, %c0_59] : memref<6x8xf32, #tpu.memory_space<vmem>>, vector<6x8xf32>
    %c0_60 = arith.constant 0 : index
    %c0_61 = arith.constant 0 : index
    %128 = vector.load %arg23[%c0_60, %c0_61] : memref<1x8xf32, #tpu.memory_space<vmem>>, vector<1x8xf32>
    %c0_62 = arith.constant 0 : index
    %c0_63 = arith.constant 0 : index
    %129 = vector.load %arg24[%c0_62, %c0_63] : memref<8x16xf32, #tpu.memory_space<vmem>>, vector<8x16xf32>
    %c0_64 = arith.constant 0 : index
    %c0_65 = arith.constant 0 : index
    %130 = vector.load %arg25[%c0_64, %c0_65] : memref<1x16xf32, #tpu.memory_space<vmem>>, vector<1x16xf32>
    %c0_66 = arith.constant 0 : index
    %c0_67 = arith.constant 0 : index
    %131 = vector.load %arg26[%c0_66, %c0_67] : memref<1x4xf32, #tpu.memory_space<vmem>>, vector<1x4xf32>
    %c0_68 = arith.constant 0 : index
    %c0_69 = arith.constant 0 : index
    %132 = vector.load %arg27[%c0_68, %c0_69] : memref<4x4xf32, #tpu.memory_space<vmem>>, vector<4x4xf32>
    %c0_70 = arith.constant 0 : index
    %c0_71 = arith.constant 0 : index
    %133 = vector.load %arg28[%c0_70, %c0_71] : memref<4x4xf32, #tpu.memory_space<vmem>>, vector<4x4xf32>
    %c0_72 = arith.constant 0 : index
    %c0_73 = arith.constant 0 : index
    %134 = vector.load %arg29[%c0_72, %c0_73] : memref<1x4xf32, #tpu.memory_space<vmem>>, vector<1x4xf32>
    %cst_74 = arith.constant dense<0.000000e+00> : vector<5x4xf32>
    %135 = tpu.matmul %121, %125, %cst_74 {dimension_numbers = #tpu.dot_dimension_numbers<[1], [0], [0], [1], [0, 0, 1, 1], [], []>} : vector<5x4xf32>, vector<4x4xf32>, vector<5x4xf32> -> vector<5x4xf32>
    %136 = vector.broadcast %126 : vector<1x4xf32> to vector<5x4xf32>
    %137 = arith.addf %135, %136 : vector<5x4xf32>
    %cst_75 = arith.constant 0.000000e+00 : f32
    %138 = vector.broadcast %cst_75 : f32 to vector<5x4xf32>
    %139 = arith.maximumf %137, %138 : vector<5x4xf32>
    %cst_76 = arith.constant dense<0.000000e+00> : vector<10x8xf32>
    %140 = tpu.matmul %122, %127, %cst_76 {dimension_numbers = #tpu.dot_dimension_numbers<[1], [0], [0], [1], [0, 0, 1, 1], [], []>} : vector<10x6xf32>, vector<6x8xf32>, vector<10x8xf32> -> vector<10x8xf32>
    %141 = vector.broadcast %128 : vector<1x8xf32> to vector<10x8xf32>
    %142 = arith.addf %140, %141 : vector<10x8xf32>
    %cst_77 = arith.constant 0.000000e+00 : f32
    %143 = vector.broadcast %cst_77 : f32 to vector<10x8xf32>
    %144 = arith.maximumf %142, %143 : vector<10x8xf32>
    %cst_78 = arith.constant dense<0.000000e+00> : vector<10x16xf32>
    %145 = tpu.matmul %144, %129, %cst_78 {dimension_numbers = #tpu.dot_dimension_numbers<[1], [0], [0], [1], [0, 0, 1, 1], [], []>} : vector<10x8xf32>, vector<8x16xf32>, vector<10x16xf32> -> vector<10x16xf32>
    %146 = vector.broadcast %130 : vector<1x16xf32> to vector<10x16xf32>
    %147 = arith.addf %145, %146 : vector<10x16xf32>
    %cst_79 = arith.constant dense<0.000000e+00> : vector<10x4xf32>
    %148 = tpu.matmul %123, %139, %cst_79 {dimension_numbers = #tpu.dot_dimension_numbers<[1], [0], [0], [1], [0, 0, 1, 1], [], []>} : vector<10x5xf32>, vector<5x4xf32>, vector<10x4xf32> -> vector<10x4xf32>
    %149 = vector.extract_strided_slice %148 {offsets = [0, 0], sizes = [10, 1], strides = [1, 1]} : vector<10x4xf32> to vector<10x1xf32>
    %150 = vector.extract_strided_slice %147 {offsets = [0, 0], sizes = [10, 4], strides = [1, 1]} : vector<10x16xf32> to vector<10x4xf32>
    %151 = vector.broadcast %149 : vector<10x1xf32> to vector<10x4xf32>
    %152 = arith.mulf %151, %150 : vector<10x4xf32>
    %153 = vector.extract_strided_slice %148 {offsets = [0, 1], sizes = [10, 1], strides = [1, 1]} : vector<10x4xf32> to vector<10x1xf32>
    %154 = vector.extract_strided_slice %147 {offsets = [0, 4], sizes = [10, 4], strides = [1, 1]} : vector<10x16xf32> to vector<10x4xf32>
    %155 = vector.broadcast %153 : vector<10x1xf32> to vector<10x4xf32>
    %156 = arith.mulf %155, %154 : vector<10x4xf32>
    %157 = arith.addf %152, %156 : vector<10x4xf32>
    %158 = vector.extract_strided_slice %148 {offsets = [0, 2], sizes = [10, 1], strides = [1, 1]} : vector<10x4xf32> to vector<10x1xf32>
    %159 = vector.extract_strided_slice %147 {offsets = [0, 8], sizes = [10, 4], strides = [1, 1]} : vector<10x16xf32> to vector<10x4xf32>
    %160 = vector.broadcast %158 : vector<10x1xf32> to vector<10x4xf32>
    %161 = arith.mulf %160, %159 : vector<10x4xf32>
    %162 = arith.addf %157, %161 : vector<10x4xf32>
    %163 = vector.extract_strided_slice %148 {offsets = [0, 3], sizes = [10, 1], strides = [1, 1]} : vector<10x4xf32> to vector<10x1xf32>
    %164 = vector.extract_strided_slice %147 {offsets = [0, 12], sizes = [10, 4], strides = [1, 1]} : vector<10x16xf32> to vector<10x4xf32>
    %165 = vector.broadcast %163 : vector<10x1xf32> to vector<10x4xf32>
    %166 = arith.mulf %165, %164 : vector<10x4xf32>
    %167 = arith.addf %162, %166 : vector<10x4xf32>
    %cst_80 = arith.constant dense<0.000000e+00> : vector<5x4xf32>
    %168 = tpu.matmul %124, %167, %cst_80 {dimension_numbers = #tpu.dot_dimension_numbers<[1], [0], [0], [1], [0, 0, 1, 1], [], []>} : vector<5x10xf32>, vector<10x4xf32>, vector<5x4xf32> -> vector<5x4xf32>
    %169 = arith.addf %168, %139 : vector<5x4xf32>
    %170 = vector.broadcast %131 : vector<1x4xf32> to vector<5x4xf32>
    %171 = arith.addf %169, %170 : vector<5x4xf32>
    %cst_81 = arith.constant 0.000000e+00 : f32
    %172 = vector.broadcast %cst_81 : f32 to vector<5x4xf32>
    %173 = arith.maximumf %171, %172 : vector<5x4xf32>
    %cst_82 = arith.constant dense<0.000000e+00> : vector<5x4xf32>
    %174 = tpu.matmul %173, %132, %cst_82 {dimension_numbers = #tpu.dot_dimension_numbers<[1], [0], [0], [1], [0, 0, 1, 1], [], []>} : vector<5x4xf32>, vector<4x4xf32>, vector<5x4xf32> -> vector<5x4xf32>
    %cst_83 = arith.constant dense<0.000000e+00> : vector<5x4xf32>
    %175 = tpu.matmul %139, %133, %cst_83 {dimension_numbers = #tpu.dot_dimension_numbers<[1], [0], [0], [1], [0, 0, 1, 1], [], []>} : vector<5x4xf32>, vector<4x4xf32>, vector<5x4xf32> -> vector<5x4xf32>
    %176 = arith.addf %174, %175 : vector<5x4xf32>
    %177 = vector.broadcast %134 : vector<1x4xf32> to vector<5x4xf32>
    %178 = arith.addf %176, %177 : vector<5x4xf32>
    %cst_84 = arith.constant dense<0.000000e+00> : vector<10x4xf32>
    %179 = tpu.matmul %123, %178, %cst_84 {dimension_numbers = #tpu.dot_dimension_numbers<[1], [0], [0], [1], [0, 0, 1, 1], [], []>} : vector<10x5xf32>, vector<5x4xf32>, vector<10x4xf32> -> vector<10x4xf32>
    %180 = vector.extract_strided_slice %179 {offsets = [0, 0], sizes = [10, 1], strides = [1, 1]} : vector<10x4xf32> to vector<10x1xf32>
    %181 = vector.extract_strided_slice %147 {offsets = [0, 0], sizes = [10, 4], strides = [1, 1]} : vector<10x16xf32> to vector<10x4xf32>
    %182 = vector.broadcast %180 : vector<10x1xf32> to vector<10x4xf32>
    %183 = arith.mulf %182, %181 : vector<10x4xf32>
    %184 = vector.extract_strided_slice %179 {offsets = [0, 1], sizes = [10, 1], strides = [1, 1]} : vector<10x4xf32> to vector<10x1xf32>
    %185 = vector.extract_strided_slice %147 {offsets = [0, 4], sizes = [10, 4], strides = [1, 1]} : vector<10x16xf32> to vector<10x4xf32>
    %186 = vector.broadcast %184 : vector<10x1xf32> to vector<10x4xf32>
    %187 = arith.mulf %186, %185 : vector<10x4xf32>
    %188 = arith.addf %183, %187 : vector<10x4xf32>
    %189 = vector.extract_strided_slice %179 {offsets = [0, 2], sizes = [10, 1], strides = [1, 1]} : vector<10x4xf32> to vector<10x1xf32>
    %190 = vector.extract_strided_slice %147 {offsets = [0, 8], sizes = [10, 4], strides = [1, 1]} : vector<10x16xf32> to vector<10x4xf32>
    %191 = vector.broadcast %189 : vector<10x1xf32> to vector<10x4xf32>
    %192 = arith.mulf %191, %190 : vector<10x4xf32>
    %193 = arith.addf %188, %192 : vector<10x4xf32>
    %194 = vector.extract_strided_slice %179 {offsets = [0, 3], sizes = [10, 1], strides = [1, 1]} : vector<10x4xf32> to vector<10x1xf32>
    %195 = vector.extract_strided_slice %147 {offsets = [0, 12], sizes = [10, 4], strides = [1, 1]} : vector<10x16xf32> to vector<10x4xf32>
    %196 = vector.broadcast %194 : vector<10x1xf32> to vector<10x4xf32>
    %197 = arith.mulf %196, %195 : vector<10x4xf32>
    %198 = arith.addf %193, %197 : vector<10x4xf32>
    %cst_85 = arith.constant dense<0.000000e+00> : vector<5x4xf32>
    %199 = tpu.matmul %124, %198, %cst_85 {dimension_numbers = #tpu.dot_dimension_numbers<[1], [0], [0], [1], [0, 0, 1, 1], [], []>} : vector<5x10xf32>, vector<10x4xf32>, vector<5x4xf32> -> vector<5x4xf32>
    %200 = arith.addf %199, %178 : vector<5x4xf32>
    %201 = vector.broadcast %131 : vector<1x4xf32> to vector<5x4xf32>
    %202 = arith.addf %200, %201 : vector<5x4xf32>
    %cst_86 = arith.constant 0.000000e+00 : f32
    %203 = vector.broadcast %cst_86 : f32 to vector<5x4xf32>
    %204 = arith.maximumf %202, %203 : vector<5x4xf32>
    %cst_87 = arith.constant dense<0.000000e+00> : vector<5x4xf32>
    %205 = tpu.matmul %204, %132, %cst_87 {dimension_numbers = #tpu.dot_dimension_numbers<[1], [0], [0], [1], [0, 0, 1, 1], [], []>} : vector<5x4xf32>, vector<4x4xf32>, vector<5x4xf32> -> vector<5x4xf32>
    %cst_88 = arith.constant dense<0.000000e+00> : vector<5x4xf32>
    %206 = tpu.matmul %178, %133, %cst_88 {dimension_numbers = #tpu.dot_dimension_numbers<[1], [0], [0], [1], [0, 0, 1, 1], [], []>} : vector<5x4xf32>, vector<4x4xf32>, vector<5x4xf32> -> vector<5x4xf32>
    %207 = arith.addf %205, %206 : vector<5x4xf32>
    %208 = vector.broadcast %134 : vector<1x4xf32> to vector<5x4xf32>
    %209 = arith.addf %207, %208 : vector<5x4xf32>
    %cst_89 = arith.constant dense<0.000000e+00> : vector<10x4xf32>
    %210 = tpu.matmul %123, %209, %cst_89 {dimension_numbers = #tpu.dot_dimension_numbers<[1], [0], [0], [1], [0, 0, 1, 1], [], []>} : vector<10x5xf32>, vector<5x4xf32>, vector<10x4xf32> -> vector<10x4xf32>
    %211 = vector.extract_strided_slice %210 {offsets = [0, 0], sizes = [10, 1], strides = [1, 1]} : vector<10x4xf32> to vector<10x1xf32>
    %212 = vector.extract_strided_slice %147 {offsets = [0, 0], sizes = [10, 4], strides = [1, 1]} : vector<10x16xf32> to vector<10x4xf32>
    %213 = vector.broadcast %211 : vector<10x1xf32> to vector<10x4xf32>
    %214 = arith.mulf %213, %212 : vector<10x4xf32>
    %215 = vector.extract_strided_slice %210 {offsets = [0, 1], sizes = [10, 1], strides = [1, 1]} : vector<10x4xf32> to vector<10x1xf32>
    %216 = vector.extract_strided_slice %147 {offsets = [0, 4], sizes = [10, 4], strides = [1, 1]} : vector<10x16xf32> to vector<10x4xf32>
    %217 = vector.broadcast %215 : vector<10x1xf32> to vector<10x4xf32>
    %218 = arith.mulf %217, %216 : vector<10x4xf32>
    %219 = arith.addf %214, %218 : vector<10x4xf32>
    %220 = vector.extract_strided_slice %210 {offsets = [0, 2], sizes = [10, 1], strides = [1, 1]} : vector<10x4xf32> to vector<10x1xf32>
    %221 = vector.extract_strided_slice %147 {offsets = [0, 8], sizes = [10, 4], strides = [1, 1]} : vector<10x16xf32> to vector<10x4xf32>
    %222 = vector.broadcast %220 : vector<10x1xf32> to vector<10x4xf32>
    %223 = arith.mulf %222, %221 : vector<10x4xf32>
    %224 = arith.addf %219, %223 : vector<10x4xf32>
    %225 = vector.extract_strided_slice %210 {offsets = [0, 3], sizes = [10, 1], strides = [1, 1]} : vector<10x4xf32> to vector<10x1xf32>
    %226 = vector.extract_strided_slice %147 {offsets = [0, 12], sizes = [10, 4], strides = [1, 1]} : vector<10x16xf32> to vector<10x4xf32>
    %227 = vector.broadcast %225 : vector<10x1xf32> to vector<10x4xf32>
    %228 = arith.mulf %227, %226 : vector<10x4xf32>
    %229 = arith.addf %224, %228 : vector<10x4xf32>
    %cst_90 = arith.constant dense<0.000000e+00> : vector<5x4xf32>
    %230 = tpu.matmul %124, %229, %cst_90 {dimension_numbers = #tpu.dot_dimension_numbers<[1], [0], [0], [1], [0, 0, 1, 1], [], []>} : vector<5x10xf32>, vector<10x4xf32>, vector<5x4xf32> -> vector<5x4xf32>
    %231 = arith.addf %230, %209 : vector<5x4xf32>
    %232 = vector.broadcast %131 : vector<1x4xf32> to vector<5x4xf32>
    %233 = arith.addf %231, %232 : vector<5x4xf32>
    %cst_91 = arith.constant 0.000000e+00 : f32
    %234 = vector.broadcast %cst_91 : f32 to vector<5x4xf32>
    %235 = arith.maximumf %233, %234 : vector<5x4xf32>
    %cst_92 = arith.constant dense<0.000000e+00> : vector<5x4xf32>
    %236 = tpu.matmul %235, %132, %cst_92 {dimension_numbers = #tpu.dot_dimension_numbers<[1], [0], [0], [1], [0, 0, 1, 1], [], []>} : vector<5x4xf32>, vector<4x4xf32>, vector<5x4xf32> -> vector<5x4xf32>
    %cst_93 = arith.constant dense<0.000000e+00> : vector<5x4xf32>
    %237 = tpu.matmul %209, %133, %cst_93 {dimension_numbers = #tpu.dot_dimension_numbers<[1], [0], [0], [1], [0, 0, 1, 1], [], []>} : vector<5x4xf32>, vector<4x4xf32>, vector<5x4xf32> -> vector<5x4xf32>
    %238 = arith.addf %236, %237 : vector<5x4xf32>
    %239 = vector.broadcast %134 : vector<1x4xf32> to vector<5x4xf32>
    %240 = arith.addf %238, %239 : vector<5x4xf32>
    %241 = arith.addf %240, %121 : vector<5x4xf32>
    %c0_94 = arith.constant 0 : index
    %c0_95 = arith.constant 0 : index
    %242 = vector.load %arg8[%c0_94, %c0_95] : memref<6x1xf32, #tpu.memory_space<vmem>>, vector<6x1xf32>
    %c0_96 = arith.constant 0 : index
    %c0_97 = arith.constant 0 : index
    %243 = vector.load %arg9[%c0_96, %c0_97] : memref<1x5xf32, #tpu.memory_space<vmem>>, vector<1x5xf32>
    %cst_98 = arith.constant dense<0.000000e+00> : vector<6x5xf32>
    %244 = tpu.matmul %242, %243, %cst_98 {dimension_numbers = #tpu.dot_dimension_numbers<[1], [0], [0], [1], [0, 0, 1, 1], [], []>} : vector<6x1xf32>, vector<1x5xf32>, vector<6x5xf32> -> vector<6x5xf32>
    "tpu.trace_start"() <{level = 10 : i32, message = "nd,md->nm"}> : () -> ()
    %cst_99 = arith.constant dense<0.000000e+00> : vector<6x5xf32>
    %245 = tpu.matmul %120, %241, %cst_99 {dimension_numbers = #tpu.dot_dimension_numbers<[1], [1], [0], [0], [0, 0, 1, 0], [], []>} : vector<6x4xf32>, vector<5x4xf32>, vector<6x5xf32> -> vector<6x5xf32>
    "tpu.trace_stop"() : () -> ()
    %246 = math.tanh %245 : vector<6x5xf32>
    %247 = arith.mulf %246, %244 : vector<6x5xf32>
    %cst_100 = arith.constant dense<0.000000e+00> : vector<6x4xf32>
    %248 = tpu.matmul %247, %241, %cst_100 {dimension_numbers = #tpu.dot_dimension_numbers<[1], [0], [0], [1], [0, 0, 1, 1], [], []>} : vector<6x5xf32>, vector<5x4xf32>, vector<6x4xf32> -> vector<6x4xf32>
    "tpu.trace_start"() <{level = 10 : i32, message = "nm,nd->md"}> : () -> ()
    %cst_101 = arith.constant dense<0.000000e+00> : vector<5x4xf32>
    %249 = tpu.matmul %247, %120, %cst_101 {dimension_numbers = #tpu.dot_dimension_numbers<[0], [0], [1], [1], [0, 1, 1, 1], [], []>} : vector<6x5xf32>, vector<6x4xf32>, vector<5x4xf32> -> vector<5x4xf32>
    "tpu.trace_stop"() : () -> ()
    %250 = tpu.concatenate %120, %248 in 1 : vector<6x4xf32>, vector<6x4xf32> -> vector<6x8xf32>
    %251 = tpu.concatenate %241, %249 in 1 : vector<5x4xf32>, vector<5x4xf32> -> vector<5x8xf32>
    %c0_102 = arith.constant 0 : index
    %c0_103 = arith.constant 0 : index
    %252 = vector.load %arg30[%c0_102, %c0_103] : memref<8x32xf32, #tpu.memory_space<vmem>>, vector<8x32xf32>
    %c0_104 = arith.constant 0 : index
    %c0_105 = arith.constant 0 : index
    %253 = vector.load %arg31[%c0_104, %c0_105] : memref<8x32xf32, #tpu.memory_space<vmem>>, vector<8x32xf32>
    %c0_106 = arith.constant 0 : index
    %c0_107 = arith.constant 0 : index
    %254 = vector.load %arg32[%c0_106, %c0_107] : memref<8x32xf32, #tpu.memory_space<vmem>>, vector<8x32xf32>
    %c0_108 = arith.constant 0 : index
    %c0_109 = arith.constant 0 : index
    %255 = vector.load %arg33[%c0_108, %c0_109] : memref<1x32xf32, #tpu.memory_space<vmem>>, vector<1x32xf32>
    %cst_110 = arith.constant 0.000000e+00 : f32
    %256 = vector.broadcast %cst_110 : f32 to vector<1x8xf32>
    %cst_111 = arith.constant 0.000000e+00 : f32
    %257 = vector.broadcast %cst_111 : f32 to vector<1x8xf32>
    %cst_112 = arith.constant 0.000000e+00 : f32
    %258 = vector.broadcast %cst_112 : f32 to vector<1x8xf32>
    %cst_113 = arith.constant 0.000000e+00 : f32
    %259 = vector.broadcast %cst_113 : f32 to vector<1x8xf32>
    %cst_114 = arith.constant dense<0.000000e+00> : vector<1x32xf32>
    %260 = tpu.matmul %258, %252, %cst_114 {dimension_numbers = #tpu.dot_dimension_numbers<[1], [0], [0], [1], [0, 0, 1, 1], [], []>} : vector<1x8xf32>, vector<8x32xf32>, vector<1x32xf32> -> vector<1x32xf32>
    %cst_115 = arith.constant dense<0.000000e+00> : vector<1x32xf32>
    %261 = tpu.matmul %259, %253, %cst_115 {dimension_numbers = #tpu.dot_dimension_numbers<[1], [0], [0], [1], [0, 0, 1, 1], [], []>} : vector<1x8xf32>, vector<8x32xf32>, vector<1x32xf32> -> vector<1x32xf32>
    %262 = arith.addf %260, %261 : vector<1x32xf32>
    %cst_116 = arith.constant dense<0.000000e+00> : vector<1x32xf32>
    %263 = tpu.matmul %256, %254, %cst_116 {dimension_numbers = #tpu.dot_dimension_numbers<[1], [0], [0], [1], [0, 0, 1, 1], [], []>} : vector<1x8xf32>, vector<8x32xf32>, vector<1x32xf32> -> vector<1x32xf32>
    %264 = arith.addf %262, %263 : vector<1x32xf32>
    %265 = arith.addf %264, %255 : vector<1x32xf32>
    %266 = vector.extract_strided_slice %265 {offsets = [0, 0], sizes = [1, 8], strides = [1, 1]} : vector<1x32xf32> to vector<1x8xf32>
    %267 = arith.negf %266 : vector<1x8xf32>
    %268 = math.exp %267 : vector<1x8xf32>
    %cst_117 = arith.constant 1.000000e+00 : f32
    %269 = vector.broadcast %cst_117 : f32 to vector<1x8xf32>
    %270 = arith.addf %269, %268 : vector<1x8xf32>
    %271 = arith.divf %269, %270 : vector<1x8xf32>
    %272 = vector.extract_strided_slice %265 {offsets = [0, 8], sizes = [1, 8], strides = [1, 1]} : vector<1x32xf32> to vector<1x8xf32>
    %273 = arith.negf %272 : vector<1x8xf32>
    %274 = math.exp %273 : vector<1x8xf32>
    %cst_118 = arith.constant 1.000000e+00 : f32
    %275 = vector.broadcast %cst_118 : f32 to vector<1x8xf32>
    %276 = arith.addf %275, %274 : vector<1x8xf32>
    %277 = arith.divf %275, %276 : vector<1x8xf32>
    %278 = vector.extract_strided_slice %265 {offsets = [0, 16], sizes = [1, 8], strides = [1, 1]} : vector<1x32xf32> to vector<1x8xf32>
    %279 = math.tanh %278 : vector<1x8xf32>
    %280 = vector.extract_strided_slice %265 {offsets = [0, 24], sizes = [1, 8], strides = [1, 1]} : vector<1x32xf32> to vector<1x8xf32>
    %281 = arith.negf %280 : vector<1x8xf32>
    %282 = math.exp %281 : vector<1x8xf32>
    %cst_119 = arith.constant 1.000000e+00 : f32
    %283 = vector.broadcast %cst_119 : f32 to vector<1x8xf32>
    %284 = arith.addf %283, %282 : vector<1x8xf32>
    %285 = arith.divf %283, %284 : vector<1x8xf32>
    %286 = arith.mulf %277, %257 : vector<1x8xf32>
    %287 = arith.mulf %271, %279 : vector<1x8xf32>
    %288 = arith.addf %286, %287 : vector<1x8xf32>
    %289 = math.tanh %288 : vector<1x8xf32>
    %290 = arith.mulf %285, %289 : vector<1x8xf32>
    %291 = vector.broadcast %290 : vector<1x8xf32> to vector<6x8xf32>
    %292 = arith.mulf %250, %291 : vector<6x8xf32>
    %cst_120 = arith.constant dense<0.000000e+00> : vector<6xf32>
    %293 = vector.multi_reduction <add>, %292, %cst_120 [1] : vector<6x8xf32> to vector<6xf32>
    %294 = vector.shape_cast %293 : vector<6xf32> to vector<6x1xf32>
    %cst_121 = arith.constant dense<0xFF800000> : vector<1xf32>
    %295 = vector.multi_reduction <maximumf>, %294, %cst_121 [0] : vector<6x1xf32> to vector<1xf32>
    %296 = vector.shape_cast %295 : vector<1xf32> to vector<1x1xf32>
    %297 = vector.broadcast %296 : vector<1x1xf32> to vector<6x1xf32>
    %298 = arith.subf %294, %297 : vector<6x1xf32>
    %299 = math.exp %298 : vector<6x1xf32>
    %cst_122 = arith.constant dense<0.000000e+00> : vector<1xf32>
    %300 = vector.multi_reduction <add>, %299, %cst_122 [0] : vector<6x1xf32> to vector<1xf32>
    %301 = vector.shape_cast %300 : vector<1xf32> to vector<1x1xf32>
    %302 = vector.broadcast %301 : vector<1x1xf32> to vector<6x1xf32>
    %303 = arith.divf %299, %302 : vector<6x1xf32>
    %304 = vector.broadcast %303 : vector<6x1xf32> to vector<6x8xf32>
    %305 = arith.mulf %250, %304 : vector<6x8xf32>
    %cst_123 = arith.constant dense<0.000000e+00> : vector<8xf32>
    %306 = vector.multi_reduction <add>, %305, %cst_123 [0] : vector<6x8xf32> to vector<8xf32>
    %307 = vector.shape_cast %306 : vector<8xf32> to vector<1x8xf32>
    %cst_124 = arith.constant dense<0.000000e+00> : vector<1x32xf32>
    %308 = tpu.matmul %290, %252, %cst_124 {dimension_numbers = #tpu.dot_dimension_numbers<[1], [0], [0], [1], [0, 0, 1, 1], [], []>} : vector<1x8xf32>, vector<8x32xf32>, vector<1x32xf32> -> vector<1x32xf32>
    %cst_125 = arith.constant dense<0.000000e+00> : vector<1x32xf32>
    %309 = tpu.matmul %307, %253, %cst_125 {dimension_numbers = #tpu.dot_dimension_numbers<[1], [0], [0], [1], [0, 0, 1, 1], [], []>} : vector<1x8xf32>, vector<8x32xf32>, vector<1x32xf32> -> vector<1x32xf32>
    %310 = arith.addf %308, %309 : vector<1x32xf32>
    %cst_126 = arith.constant dense<0.000000e+00> : vector<1x32xf32>
    %311 = tpu.matmul %290, %254, %cst_126 {dimension_numbers = #tpu.dot_dimension_numbers<[1], [0], [0], [1], [0, 0, 1, 1], [], []>} : vector<1x8xf32>, vector<8x32xf32>, vector<1x32xf32> -> vector<1x32xf32>
    %312 = arith.addf %310, %311 : vector<1x32xf32>
    %313 = arith.addf %312, %255 : vector<1x32xf32>
    %314 = vector.extract_strided_slice %313 {offsets = [0, 0], sizes = [1, 8], strides = [1, 1]} : vector<1x32xf32> to vector<1x8xf32>
    %315 = arith.negf %314 : vector<1x8xf32>
    %316 = math.exp %315 : vector<1x8xf32>
    %cst_127 = arith.constant 1.000000e+00 : f32
    %317 = vector.broadcast %cst_127 : f32 to vector<1x8xf32>
    %318 = arith.addf %317, %316 : vector<1x8xf32>
    %319 = arith.divf %317, %318 : vector<1x8xf32>
    %320 = vector.extract_strided_slice %313 {offsets = [0, 8], sizes = [1, 8], strides = [1, 1]} : vector<1x32xf32> to vector<1x8xf32>
    %321 = arith.negf %320 : vector<1x8xf32>
    %322 = math.exp %321 : vector<1x8xf32>
    %cst_128 = arith.constant 1.000000e+00 : f32
    %323 = vector.broadcast %cst_128 : f32 to vector<1x8xf32>
    %324 = arith.addf %323, %322 : vector<1x8xf32>
    %325 = arith.divf %323, %324 : vector<1x8xf32>
    %326 = vector.extract_strided_slice %313 {offsets = [0, 16], sizes = [1, 8], strides = [1, 1]} : vector<1x32xf32> to vector<1x8xf32>
    %327 = math.tanh %326 : vector<1x8xf32>
    %328 = vector.extract_strided_slice %313 {offsets = [0, 24], sizes = [1, 8], strides = [1, 1]} : vector<1x32xf32> to vector<1x8xf32>
    %329 = arith.negf %328 : vector<1x8xf32>
    %330 = math.exp %329 : vector<1x8xf32>
    %cst_129 = arith.constant 1.000000e+00 : f32
    %331 = vector.broadcast %cst_129 : f32 to vector<1x8xf32>
    %332 = arith.addf %331, %330 : vector<1x8xf32>
    %333 = arith.divf %331, %332 : vector<1x8xf32>
    %334 = arith.mulf %325, %288 : vector<1x8xf32>
    %335 = arith.mulf %319, %327 : vector<1x8xf32>
    %336 = arith.addf %334, %335 : vector<1x8xf32>
    %337 = math.tanh %336 : vector<1x8xf32>
    %338 = arith.mulf %333, %337 : vector<1x8xf32>
    %339 = vector.broadcast %338 : vector<1x8xf32> to vector<6x8xf32>
    %340 = arith.mulf %250, %339 : vector<6x8xf32>
    %cst_130 = arith.constant dense<0.000000e+00> : vector<6xf32>
    %341 = vector.multi_reduction <add>, %340, %cst_130 [1] : vector<6x8xf32> to vector<6xf32>
    %342 = vector.shape_cast %341 : vector<6xf32> to vector<6x1xf32>
    %cst_131 = arith.constant dense<0xFF800000> : vector<1xf32>
    %343 = vector.multi_reduction <maximumf>, %342, %cst_131 [0] : vector<6x1xf32> to vector<1xf32>
    %344 = vector.shape_cast %343 : vector<1xf32> to vector<1x1xf32>
    %345 = vector.broadcast %344 : vector<1x1xf32> to vector<6x1xf32>
    %346 = arith.subf %342, %345 : vector<6x1xf32>
    %347 = math.exp %346 : vector<6x1xf32>
    %cst_132 = arith.constant dense<0.000000e+00> : vector<1xf32>
    %348 = vector.multi_reduction <add>, %347, %cst_132 [0] : vector<6x1xf32> to vector<1xf32>
    %349 = vector.shape_cast %348 : vector<1xf32> to vector<1x1xf32>
    %350 = vector.broadcast %349 : vector<1x1xf32> to vector<6x1xf32>
    %351 = arith.divf %347, %350 : vector<6x1xf32>
    %352 = vector.broadcast %351 : vector<6x1xf32> to vector<6x8xf32>
    %353 = arith.mulf %250, %352 : vector<6x8xf32>
    %cst_133 = arith.constant dense<0.000000e+00> : vector<8xf32>
    %354 = vector.multi_reduction <add>, %353, %cst_133 [0] : vector<6x8xf32> to vector<8xf32>
    %355 = vector.shape_cast %354 : vector<8xf32> to vector<1x8xf32>
    %c0_134 = arith.constant 0 : index
    %c0_135 = arith.constant 0 : index
    %356 = vector.load %arg34[%c0_134, %c0_135] : memref<8x32xf32, #tpu.memory_space<vmem>>, vector<8x32xf32>
    %c0_136 = arith.constant 0 : index
    %c0_137 = arith.constant 0 : index
    %357 = vector.load %arg35[%c0_136, %c0_137] : memref<8x32xf32, #tpu.memory_space<vmem>>, vector<8x32xf32>
    %c0_138 = arith.constant 0 : index
    %c0_139 = arith.constant 0 : index
    %358 = vector.load %arg36[%c0_138, %c0_139] : memref<8x32xf32, #tpu.memory_space<vmem>>, vector<8x32xf32>
    %c0_140 = arith.constant 0 : index
    %c0_141 = arith.constant 0 : index
    %359 = vector.load %arg37[%c0_140, %c0_141] : memref<1x32xf32, #tpu.memory_space<vmem>>, vector<1x32xf32>
    %cst_142 = arith.constant 0.000000e+00 : f32
    %360 = vector.broadcast %cst_142 : f32 to vector<1x8xf32>
    %cst_143 = arith.constant 0.000000e+00 : f32
    %361 = vector.broadcast %cst_143 : f32 to vector<1x8xf32>
    %cst_144 = arith.constant 0.000000e+00 : f32
    %362 = vector.broadcast %cst_144 : f32 to vector<1x8xf32>
    %cst_145 = arith.constant 0.000000e+00 : f32
    %363 = vector.broadcast %cst_145 : f32 to vector<1x8xf32>
    %cst_146 = arith.constant dense<0.000000e+00> : vector<1x32xf32>
    %364 = tpu.matmul %362, %356, %cst_146 {dimension_numbers = #tpu.dot_dimension_numbers<[1], [0], [0], [1], [0, 0, 1, 1], [], []>} : vector<1x8xf32>, vector<8x32xf32>, vector<1x32xf32> -> vector<1x32xf32>
    %cst_147 = arith.constant dense<0.000000e+00> : vector<1x32xf32>
    %365 = tpu.matmul %363, %357, %cst_147 {dimension_numbers = #tpu.dot_dimension_numbers<[1], [0], [0], [1], [0, 0, 1, 1], [], []>} : vector<1x8xf32>, vector<8x32xf32>, vector<1x32xf32> -> vector<1x32xf32>
    %366 = arith.addf %364, %365 : vector<1x32xf32>
    %cst_148 = arith.constant dense<0.000000e+00> : vector<1x32xf32>
    %367 = tpu.matmul %360, %358, %cst_148 {dimension_numbers = #tpu.dot_dimension_numbers<[1], [0], [0], [1], [0, 0, 1, 1], [], []>} : vector<1x8xf32>, vector<8x32xf32>, vector<1x32xf32> -> vector<1x32xf32>
    %368 = arith.addf %366, %367 : vector<1x32xf32>
    %369 = arith.addf %368, %359 : vector<1x32xf32>
    %370 = vector.extract_strided_slice %369 {offsets = [0, 0], sizes = [1, 8], strides = [1, 1]} : vector<1x32xf32> to vector<1x8xf32>
    %371 = arith.negf %370 : vector<1x8xf32>
    %372 = math.exp %371 : vector<1x8xf32>
    %cst_149 = arith.constant 1.000000e+00 : f32
    %373 = vector.broadcast %cst_149 : f32 to vector<1x8xf32>
    %374 = arith.addf %373, %372 : vector<1x8xf32>
    %375 = arith.divf %373, %374 : vector<1x8xf32>
    %376 = vector.extract_strided_slice %369 {offsets = [0, 8], sizes = [1, 8], strides = [1, 1]} : vector<1x32xf32> to vector<1x8xf32>
    %377 = arith.negf %376 : vector<1x8xf32>
    %378 = math.exp %377 : vector<1x8xf32>
    %cst_150 = arith.constant 1.000000e+00 : f32
    %379 = vector.broadcast %cst_150 : f32 to vector<1x8xf32>
    %380 = arith.addf %379, %378 : vector<1x8xf32>
    %381 = arith.divf %379, %380 : vector<1x8xf32>
    %382 = vector.extract_strided_slice %369 {offsets = [0, 16], sizes = [1, 8], strides = [1, 1]} : vector<1x32xf32> to vector<1x8xf32>
    %383 = math.tanh %382 : vector<1x8xf32>
    %384 = vector.extract_strided_slice %369 {offsets = [0, 24], sizes = [1, 8], strides = [1, 1]} : vector<1x32xf32> to vector<1x8xf32>
    %385 = arith.negf %384 : vector<1x8xf32>
    %386 = math.exp %385 : vector<1x8xf32>
    %cst_151 = arith.constant 1.000000e+00 : f32
    %387 = vector.broadcast %cst_151 : f32 to vector<1x8xf32>
    %388 = arith.addf %387, %386 : vector<1x8xf32>
    %389 = arith.divf %387, %388 : vector<1x8xf32>
    %390 = arith.mulf %381, %361 : vector<1x8xf32>
    %391 = arith.mulf %375, %383 : vector<1x8xf32>
    %392 = arith.addf %390, %391 : vector<1x8xf32>
    %393 = math.tanh %392 : vector<1x8xf32>
    %394 = arith.mulf %389, %393 : vector<1x8xf32>
    %395 = vector.broadcast %394 : vector<1x8xf32> to vector<5x8xf32>
    %396 = arith.mulf %251, %395 : vector<5x8xf32>
    %cst_152 = arith.constant dense<0.000000e+00> : vector<5xf32>
    %397 = vector.multi_reduction <add>, %396, %cst_152 [1] : vector<5x8xf32> to vector<5xf32>
    %398 = vector.shape_cast %397 : vector<5xf32> to vector<5x1xf32>
    %cst_153 = arith.constant dense<0xFF800000> : vector<1xf32>
    %399 = vector.multi_reduction <maximumf>, %398, %cst_153 [0] : vector<5x1xf32> to vector<1xf32>
    %400 = vector.shape_cast %399 : vector<1xf32> to vector<1x1xf32>
    %401 = vector.broadcast %400 : vector<1x1xf32> to vector<5x1xf32>
    %402 = arith.subf %398, %401 : vector<5x1xf32>
    %403 = math.exp %402 : vector<5x1xf32>
    %cst_154 = arith.constant dense<0.000000e+00> : vector<1xf32>
    %404 = vector.multi_reduction <add>, %403, %cst_154 [0] : vector<5x1xf32> to vector<1xf32>
    %405 = vector.shape_cast %404 : vector<1xf32> to vector<1x1xf32>
    %406 = vector.broadcast %405 : vector<1x1xf32> to vector<5x1xf32>
    %407 = arith.divf %403, %406 : vector<5x1xf32>
    %408 = vector.broadcast %407 : vector<5x1xf32> to vector<5x8xf32>
    %409 = arith.mulf %251, %408 : vector<5x8xf32>
    %cst_155 = arith.constant dense<0.000000e+00> : vector<8xf32>
    %410 = vector.multi_reduction <add>, %409, %cst_155 [0] : vector<5x8xf32> to vector<8xf32>
    %411 = vector.shape_cast %410 : vector<8xf32> to vector<1x8xf32>
    %cst_156 = arith.constant dense<0.000000e+00> : vector<1x32xf32>
    %412 = tpu.matmul %394, %356, %cst_156 {dimension_numbers = #tpu.dot_dimension_numbers<[1], [0], [0], [1], [0, 0, 1, 1], [], []>} : vector<1x8xf32>, vector<8x32xf32>, vector<1x32xf32> -> vector<1x32xf32>
    %cst_157 = arith.constant dense<0.000000e+00> : vector<1x32xf32>
    %413 = tpu.matmul %411, %357, %cst_157 {dimension_numbers = #tpu.dot_dimension_numbers<[1], [0], [0], [1], [0, 0, 1, 1], [], []>} : vector<1x8xf32>, vector<8x32xf32>, vector<1x32xf32> -> vector<1x32xf32>
    %414 = arith.addf %412, %413 : vector<1x32xf32>
    %cst_158 = arith.constant dense<0.000000e+00> : vector<1x32xf32>
    %415 = tpu.matmul %394, %358, %cst_158 {dimension_numbers = #tpu.dot_dimension_numbers<[1], [0], [0], [1], [0, 0, 1, 1], [], []>} : vector<1x8xf32>, vector<8x32xf32>, vector<1x32xf32> -> vector<1x32xf32>
    %416 = arith.addf %414, %415 : vector<1x32xf32>
    %417 = arith.addf %416, %359 : vector<1x32xf32>
    %418 = vector.extract_strided_slice %417 {offsets = [0, 0], sizes = [1, 8], strides = [1, 1]} : vector<1x32xf32> to vector<1x8xf32>
    %419 = arith.negf %418 : vector<1x8xf32>
    %420 = math.exp %419 : vector<1x8xf32>
    %cst_159 = arith.constant 1.000000e+00 : f32
    %421 = vector.broadcast %cst_159 : f32 to vector<1x8xf32>
    %422 = arith.addf %421, %420 : vector<1x8xf32>
    %423 = arith.divf %421, %422 : vector<1x8xf32>
    %424 = vector.extract_strided_slice %417 {offsets = [0, 8], sizes = [1, 8], strides = [1, 1]} : vector<1x32xf32> to vector<1x8xf32>
    %425 = arith.negf %424 : vector<1x8xf32>
    %426 = math.exp %425 : vector<1x8xf32>
    %cst_160 = arith.constant 1.000000e+00 : f32
    %427 = vector.broadcast %cst_160 : f32 to vector<1x8xf32>
    %428 = arith.addf %427, %426 : vector<1x8xf32>
    %429 = arith.divf %427, %428 : vector<1x8xf32>
    %430 = vector.extract_strided_slice %417 {offsets = [0, 16], sizes = [1, 8], strides = [1, 1]} : vector<1x32xf32> to vector<1x8xf32>
    %431 = math.tanh %430 : vector<1x8xf32>
    %432 = vector.extract_strided_slice %417 {offsets = [0, 24], sizes = [1, 8], strides = [1, 1]} : vector<1x32xf32> to vector<1x8xf32>
    %433 = arith.negf %432 : vector<1x8xf32>
    %434 = math.exp %433 : vector<1x8xf32>
    %cst_161 = arith.constant 1.000000e+00 : f32
    %435 = vector.broadcast %cst_161 : f32 to vector<1x8xf32>
    %436 = arith.addf %435, %434 : vector<1x8xf32>
    %437 = arith.divf %435, %436 : vector<1x8xf32>
    %438 = arith.mulf %429, %392 : vector<1x8xf32>
    %439 = arith.mulf %423, %431 : vector<1x8xf32>
    %440 = arith.addf %438, %439 : vector<1x8xf32>
    %441 = math.tanh %440 : vector<1x8xf32>
    %442 = arith.mulf %437, %441 : vector<1x8xf32>
    %443 = vector.broadcast %442 : vector<1x8xf32> to vector<5x8xf32>
    %444 = arith.mulf %251, %443 : vector<5x8xf32>
    %cst_162 = arith.constant dense<0.000000e+00> : vector<5xf32>
    %445 = vector.multi_reduction <add>, %444, %cst_162 [1] : vector<5x8xf32> to vector<5xf32>
    %446 = vector.shape_cast %445 : vector<5xf32> to vector<5x1xf32>
    %cst_163 = arith.constant dense<0xFF800000> : vector<1xf32>
    %447 = vector.multi_reduction <maximumf>, %446, %cst_163 [0] : vector<5x1xf32> to vector<1xf32>
    %448 = vector.shape_cast %447 : vector<1xf32> to vector<1x1xf32>
    %449 = vector.broadcast %448 : vector<1x1xf32> to vector<5x1xf32>
    %450 = arith.subf %446, %449 : vector<5x1xf32>
    %451 = math.exp %450 : vector<5x1xf32>
    %cst_164 = arith.constant dense<0.000000e+00> : vector<1xf32>
    %452 = vector.multi_reduction <add>, %451, %cst_164 [0] : vector<5x1xf32> to vector<1xf32>
    %453 = vector.shape_cast %452 : vector<1xf32> to vector<1x1xf32>
    %454 = vector.broadcast %453 : vector<1x1xf32> to vector<5x1xf32>
    %455 = arith.divf %451, %454 : vector<5x1xf32>
    %456 = vector.broadcast %455 : vector<5x1xf32> to vector<5x8xf32>
    %457 = arith.mulf %251, %456 : vector<5x8xf32>
    %cst_165 = arith.constant dense<0.000000e+00> : vector<8xf32>
    %458 = vector.multi_reduction <add>, %457, %cst_165 [0] : vector<5x8xf32> to vector<8xf32>
    %459 = vector.shape_cast %458 : vector<8xf32> to vector<1x8xf32>
    %c0_166 = arith.constant 0 : index
    %c0_167 = arith.constant 0 : index
    %460 = vector.load %arg38[%c0_166, %c0_167] : memref<8x16xf32, #tpu.memory_space<vmem>>, vector<8x16xf32>
    %cst_168 = arith.constant dense<0.000000e+00> : vector<1x16xf32>
    %461 = tpu.matmul %338, %460, %cst_168 {dimension_numbers = #tpu.dot_dimension_numbers<[1], [0], [0], [1], [0, 0, 1, 1], [], []>} : vector<1x8xf32>, vector<8x16xf32>, vector<1x16xf32> -> vector<1x16xf32>
    %c0_169 = arith.constant 0 : index
    %c0_170 = arith.constant 0 : index
    %462 = vector.load %arg39[%c0_169, %c0_170] : memref<8x16xf32, #tpu.memory_space<vmem>>, vector<8x16xf32>
    %cst_171 = arith.constant dense<0.000000e+00> : vector<1x16xf32>
    %463 = tpu.matmul %355, %462, %cst_171 {dimension_numbers = #tpu.dot_dimension_numbers<[1], [0], [0], [1], [0, 0, 1, 1], [], []>} : vector<1x8xf32>, vector<8x16xf32>, vector<1x16xf32> -> vector<1x16xf32>
    %464 = arith.addf %461, %463 : vector<1x16xf32>
    %c0_172 = arith.constant 0 : index
    %c0_173 = arith.constant 0 : index
    %465 = vector.load %arg40[%c0_172, %c0_173] : memref<8x16xf32, #tpu.memory_space<vmem>>, vector<8x16xf32>
    %cst_174 = arith.constant dense<0.000000e+00> : vector<1x16xf32>
    %466 = tpu.matmul %442, %465, %cst_174 {dimension_numbers = #tpu.dot_dimension_numbers<[1], [0], [0], [1], [0, 0, 1, 1], [], []>} : vector<1x8xf32>, vector<8x16xf32>, vector<1x16xf32> -> vector<1x16xf32>
    %467 = arith.addf %464, %466 : vector<1x16xf32>
    %c0_175 = arith.constant 0 : index
    %c0_176 = arith.constant 0 : index
    %468 = vector.load %arg41[%c0_175, %c0_176] : memref<8x16xf32, #tpu.memory_space<vmem>>, vector<8x16xf32>
    %cst_177 = arith.constant dense<0.000000e+00> : vector<1x16xf32>
    %469 = tpu.matmul %459, %468, %cst_177 {dimension_numbers = #tpu.dot_dimension_numbers<[1], [0], [0], [1], [0, 0, 1, 1], [], []>} : vector<1x8xf32>, vector<8x16xf32>, vector<1x16xf32> -> vector<1x16xf32>
    %470 = arith.addf %467, %469 : vector<1x16xf32>
    %c0_178 = arith.constant 0 : index
    %c0_179 = arith.constant 0 : index
    %471 = vector.load %arg42[%c0_178, %c0_179] : memref<1x16xf32, #tpu.memory_space<vmem>>, vector<1x16xf32>
    %472 = arith.addf %470, %471 : vector<1x16xf32>
    %cst_180 = arith.constant 0.000000e+00 : f32
    %473 = vector.broadcast %cst_180 : f32 to vector<1x16xf32>
    %474 = arith.maximumf %472, %473 : vector<1x16xf32>
    %c0_181 = arith.constant 0 : index
    %c0_182 = arith.constant 0 : index
    %475 = vector.load %arg43[%c0_181, %c0_182] : memref<16x1xf32, #tpu.memory_space<vmem>>, vector<16x1xf32>
    %cst_183 = arith.constant dense<0.000000e+00> : vector<1x1xf32>
    %476 = tpu.matmul %474, %475, %cst_183 {dimension_numbers = #tpu.dot_dimension_numbers<[1], [0], [0], [1], [0, 0, 1, 1], [], []>} : vector<1x16xf32>, vector<16x1xf32>, vector<1x1xf32> -> vector<1x1xf32>
    %c0_184 = arith.constant 0 : index
    %c0_185 = arith.constant 0 : index
    %477 = vector.load %arg44[%c0_184, %c0_185] : memref<1x1xf32, #tpu.memory_space<vmem>>, vector<1x1xf32>
    %478 = arith.addf %476, %477 : vector<1x1xf32>
    %c0_186 = arith.constant 0 : index
    %c0_187 = arith.constant 0 : index
    %479 = vector.load %arg45[%c0_186, %c0_187] : memref<1x1xf32, #tpu.memory_space<vmem>>, vector<1x1xf32>
    tpu.vector_store %arg45[%c0_186, %c0_187], %478 {strides = array<i32>} : memref<1x1xf32, #tpu.memory_space<vmem>>, vector<1x1xf32>,
    return
  }
}

</mosaic_0001>

<bundles_post_ra>
// kernel: tpu_custom_call.1
= control target key start
LH: loop header
LB: loop body
LE: loop exit
PB: predicated region body
PF: predicated region fallthrough
CT: control target
= control target key end

     0   :  { %s5656_s6 = smov 1   ;;  %s5657_s10 = smov 2   ;;  %s6605_s0 = inlined_call_operand.smem [shape: u32[46], index: -1, kind: input, shape index: {}] }
   0x1   :  { %s5726_s5 = sld [smem:[%s6605_s0]]   ;;  %s5658_s14 = smov 3  }
   0x2   :  { %s5731_s9 = sld [smem:[%s6605_s0 + %s5656_s6]]   ;;  %s5659_s18 = smov 4  }
   0x3   :  { %s5736_s13 = sld [smem:[%s6605_s0 + %s5657_s10]]   ;;  %s5660_s22 = smov 5  }
   0x4   :  { %s5741_s17 = sld [smem:[%s6605_s0 + %s5658_s14]]   ;;  %s5661_s26 = smov 6  }
   0x5   :  { %s5746_s21 = sld [smem:[%s6605_s0 + %s5659_s18]]   ;;  %s5662_s30 = smov 7  }
   0x6   :  { %s5751_s25 = sld [smem:[%s6605_s0 + %s5660_s22]]   ;;  %s5663_s4 = smov 8  }
   0x7   :  { %s5756_s29 = sld [smem:[%s6605_s0 + %s5661_s26]]   ;;  %s5664_s10 = smov 9  }
   0x8   :  { %s5761_s3 = sld [smem:[%s6605_s0 + %s5662_s30]]   ;;  %s5665_s15 = smov 10  }
   0x9   :  { %s5766_s8 = sld [smem:[%s6605_s0 + %s5663_s4]]   ;;  %s5666_s20 = smov 11  }
   0xa   :  { %s5771_s14 = sld [smem:[%s6605_s0 + %s5664_s10]]   ;;  %s5667_s26 = smov 12  }
   0xb   :  { %6608 = sst [smem:[#allocation6_spill]] %s5746_s21  ;;  %s5668_s1 = smov 13  }
   0xc   :  { %6609 = sst [smem:[#allocation7_spill]] %s5751_s25  ;;  %s5669_s7 = smov 14  }
   0xd   :  { %6610 = sst [smem:[#allocation8_spill]] %s5756_s29  ;;  %s5671_s22 = smov 16  }
   0xe   :  { %6611 = sst [smem:[#allocation9_spill]] %s5761_s3  ;;  %s5672_s28 = smov 17  }
   0xf   :  { %6612 = sst [smem:[#allocation10_spill]] %s5766_s8 }
  0x10   :  { %6613 = sst [smem:[#allocation11_spill]] %s5771_s14 }
  0x11   :  { %s5776_s19 = sld [smem:[%s6605_s0 + %s5665_s15]]   ;;  %s5670_s15 = smov 15  }
  0x12   :  { %s5781_s24 = sld [smem:[%s6605_s0 + %s5666_s20]]  }
  0x13   :  { %s5786_s30 = sld [smem:[%s6605_s0 + %s5667_s26]]  }
  0x14   :  { %s5791_s6 = sld [smem:[%s6605_s0 + %s5668_s1]]   ;;  %s5700_s1 = smov 45  }
  0x15   :  { %s5796_s12 = sld [smem:[%s6605_s0 + %s5669_s7]]   ;;  %s5673_s7 = smov 18  }
  0x16   :  { %s5801_s20 = sld [smem:[%s6605_s0 + %s5670_s15]]   ;;  %s5674_s15 = smov 19  }
  0x17   :  { %s5806_s27 = sld [smem:[%s6605_s0 + %s5671_s22]]   ;;  %s5675_s22 = smov 20  }
  0x18   :  { %s5811_s4 = sld [smem:[%s6605_s0 + %s5672_s28]]   ;;  %s5676_s28 = smov 21  }
  0x19   :  { %s5816_s8 = sld [smem:[%s6605_s0 + %s5673_s7]]   ;;  %s5677_s7 = smov 22  }
  0x1a   :  { %s5821_s14 = sld [smem:[%s6605_s0 + %s5674_s15]]   ;;  %s5678_s15 = smov 23  }
  0x1b   :  { %s5826_s3 = sld [smem:[%s6605_s0 + %s5675_s22]]   ;;  %s5679_s22 = smov 24  }
  0x1c   :  { %s5831_s29 = sld [smem:[%s6605_s0 + %s5676_s28]]   ;;  %s5680_s28 = smov 25  }
  0x1d   :  { %s5836_s25 = sld [smem:[%s6605_s0 + %s5677_s7]]   ;;  %s5681_s7 = smov 26  }
  0x1e   :  { %s5841_s21 = sld [smem:[%s6605_s0 + %s5678_s15]]   ;;  %s5682_s15 = smov 27  }
  0x21   :  { %6614 = sst [smem:[#allocation12_spill]] %s5826_s3 }
  0x22   :  { %6615 = sst [smem:[#allocation13_spill]] %s5831_s29 }
  0x23   :  { %6616 = sst [smem:[#allocation14_spill]] %s5836_s25 }
  0x24   :  { %6617 = sst [smem:[#allocation15_spill]] %s5841_s21 }
  0x25   :  { %s5846_s3 = sld [smem:[%s6605_s0 + %s5679_s22]]   ;;  %s5683_s22 = smov 28  }
  0x26   :  { %s5851_s29 = sld [smem:[%s6605_s0 + %s5680_s28]]   ;;  %s5684_s28 = smov 29  }
  0x27   :  { %s5856_s25 = sld [smem:[%s6605_s0 + %s5681_s7]]   ;;  %s5685_s7 = smov 30  }
  0x28   :  { %s5861_s21 = sld [smem:[%s6605_s0 + %s5682_s15]]   ;;  %s5686_s15 = smov 31  }
  0x2b   :  { %6618 = sst [smem:[#allocation16_spill]] %s5846_s3 }
  0x2c   :  { %6619 = sst [smem:[#allocation17_spill]] %s5851_s29 }
  0x2d   :  { %6620 = sst [smem:[#allocation18_spill]] %s5856_s25 }
  0x2e   :  { %6621 = sst [smem:[#allocation19_spill]] %s5861_s21 }
  0x2f   :  { %s5866_s3 = sld [smem:[%s6605_s0 + %s5683_s22]]   ;;  %s5687_s22 = smov 32  }
  0x30   :  { %s5871_s29 = sld [smem:[%s6605_s0 + %s5684_s28]]   ;;  %s5688_s28 = smov 33  }
  0x31   :  { %s5876_s25 = sld [smem:[%s6605_s0 + %s5685_s7]]   ;;  %s5689_s7 = smov 34  }
  0x32   :  { %s5881_s21 = sld [smem:[%s6605_s0 + %s5686_s15]]   ;;  %s5690_s15 = smov 35  }
  0x35   :  { %6622 = sst [smem:[#allocation20_spill]] %s5866_s3 }
  0x36   :  { %6623 = sst [smem:[#allocation21_spill]] %s5871_s29 }
  0x37   :  { %6624 = sst [smem:[#allocation22_spill]] %s5876_s25 }
  0x38   :  { %6625 = sst [smem:[#allocation23_spill]] %s5881_s21 }
  0x39   :  { %s5886_s3 = sld [smem:[%s6605_s0 + %s5687_s22]]   ;;  %s5691_s22 = smov 36  }
  0x3a   :  { %s5891_s29 = sld [smem:[%s6605_s0 + %s5688_s28]]   ;;  %s5692_s28 = smov 37  }
  0x3b   :  { %s5896_s25 = sld [smem:[%s6605_s0 + %s5689_s7]]   ;;  %s5693_s7 = smov 38  }
  0x3c   :  { %s5901_s21 = sld [smem:[%s6605_s0 + %s5690_s15]]   ;;  %s5694_s15 = smov 39  }
  0x3f   :  { %6626 = sst [smem:[#allocation24_spill]] %s5886_s3 }
  0x40   :  { %6627 = sst [smem:[#allocation25_spill]] %s5891_s29 }
  0x41   :  { %6628 = sst [smem:[#allocation26_spill]] %s5896_s25 }
  0x42   :  { %6629 = sst [smem:[#allocation27_spill]] %s5901_s21 }
  0x43   :  { %s5906_s3 = sld [smem:[%s6605_s0 + %s5691_s22]]   ;;  %s5695_s22 = smov 40  }
  0x44   :  { %s5911_s29 = sld [smem:[%s6605_s0 + %s5692_s28]]   ;;  %s5696_s28 = smov 41  }
  0x45   :  { %s5916_s25 = sld [smem:[%s6605_s0 + %s5693_s7]]   ;;  %s5697_s7 = smov 42  }
  0x46   :  { %s5921_s21 = sld [smem:[%s6605_s0 + %s5694_s15]]   ;;  %s5698_s15 = smov 43  }
  0x49   :  { %6630 = sst [smem:[#allocation28_spill]] %s5906_s3 }
  0x4a   :  { %6631 = sst [smem:[#allocation29_spill]] %s5911_s29 }
  0x4b   :  { %6632 = sst [smem:[#allocation30_spill]] %s5916_s25 }
  0x4c   :  { %6633 = sst [smem:[#allocation31_spill]] %s5921_s21 }
  0x4d   :  { %s5926_s3 = sld [smem:[%s6605_s0 + %s5695_s22]]   ;;  %s5699_s22 = smov 44  }
  0x4e   :  { %s5931_s29 = sld [smem:[%s6605_s0 + %s5696_s28]]  }
  0x4f   :  { %s5936_s25 = sld [smem:[%s6605_s0 + %s5697_s7]]  }
  0x50   :  { %s5941_s21 = sld [smem:[%s6605_s0 + %s5698_s15]]  }
  0x53   :  { %6634 = sst [smem:[#allocation32_spill]] %s5926_s3 }
  0x54   :  { %6635 = sst [smem:[#allocation33_spill]] %s5931_s29 }
  0x55   :  { %s4957_s3 = sld [smem:[%s6605_s0 + %s5699_s22]]  }
  0x56   :  { %s5949_s29 = sld [smem:[%s6605_s0 + %s5700_s1]]  }
  0x5b   :  { %v96_v0 = vstv %s4957_s3 }
  0x5c   :  { %97 = vst [vmem:[#allocation2] sm:$0x1] %v96_v0 }
  0x5d   :  { %v195_v1 = vld [vmem:[%s5776_s19] sm:$0xf]  ;;  %vm215_vm0 = vcmask 1043456   ;;  %vm211_vm1 = vcmask 31744   ;;  %v5701_v2 = vmov 0.0   ;;  %vm5702_vm2 = vmmov 0  }
  0x5e   :  { %5179 = vmatprep.subr.mxu0 %v5701_v2  ;;  %5181 = vmatprep.mubr.msk.f32.mxu0 %vm5702_vm2, %v5701_v2  ;;  %v189_v3 = vld [vmem:[%s5726_s5] sm:$0x3f]  ;;  %vm303_vm3 = vcmask 1045504   ;;  %vm296_vm4 = vcmask 48128   ;;  %v191_v6 = vld [vmem:[%s5731_s9 + $0x8] sm:$0xf] }
  0x5f   :  { %v197_v4 = vld [vmem:[%s5786_s30] sm:$0x3f]  ;;  %5180 = vmatpush3.msk.msra.mxu0 %vm215_vm0, %v195_v1 }
  0x60   :  { %v190_v5 = vld [vmem:[%s5731_s9] sm:$0xff]  ;;  %5184 = vmatprep.subr.msk.mxu1 %vm303_vm3, %v197_v4  ;;  %5182 = vmatmul.mubr.msk.f32.vlgmr.msra.gmra.mrb[0].mxu0 %vm211_vm1, %v189_v3 }
  0x61   :  { %5185 = vmatpush3.msk.msra.mxu1 %vm303_vm3, %v197_v4 }
  0x62   :  { %98 = vsyncpa [#allocation4], 0  ;;  %5186 = vmatprep.mubr.msk.f32.mxu1 %vm296_vm4, %v190_v5  ;;  %v5966_v7 = vld [vmem:[%s5736_s13] sm:$0xff]  ;;  %v5703_v9 = vmov 2   ;;  %v5704_v10 = vmov 1   ;;  %vm390_vm5 = vcmask 64512  }
  0x63   :  { %5187 = vmatmul.mubr.msk.f32.vlgmr.msra.gmra.mrb[0].mxu1 %vm296_vm4, %v191_v6  ;;  %v199_v8 = vld [vmem:[%s5796_s12] sm:$0xff]  ;;  %5538 = vset.pattern.permute.xlu1 %v5703_v9  ;;  %v5978_v20 = vld [vmem:[%s5736_s13 + $0x8] sm:$0xf]  ;;  %v5705_v31 = vmov 3   ;;  %v5706_v32 = vmov 0   ;;  %s5707_s0 = smov 124  }
  0x64   :  { %5196 = vmatprep.mubr.msk.f32.mxu1 %vm296_vm4, %v5966_v7  ;;  %5189 = vmatprep.subr.mxu0 %v199_v8  ;;  %v4959_v11 = vld [vmem:[%s5781_s24] ss:$0 sm:$0xff]  ;;  %v5708_v43 = vmov 0.0|0.0   ;;  %s5709_s9 = smov 120   ;;  %s5710_s13 = smov 116   ;;  %vm5711_vm6 = vmmov 1  }
  0x65   :  { %5190 = vmatpush3.msra.mxu0 %v199_v8  ;;  %5537 = vset.pattern.permute.xlu0 %v5704_v10  ;;  %v4962_v13 = vld [vmem:[%s5791_s6] ss:$0 sm:$0xff]  ;;  %vm6032_vm7 = vmpackc.low %vm215_vm0, %vm5711_vm6  ;;  %vm628_vm8 = vcmask 97280   ;;  %s6639_s3 = sld [smem:[#allocation6_spill]]  ;;  %s6642_s19 = sld [smem:[#allocation7_spill]]  ;;  %vm1899_vm9 = vcmask 1044480  }
  0x66   :  { %v5983_v22 = vld [vmem:[%s5816_s8] sm:$0xf]  ;;  %5448 = vmatprep.subr.bf16.mxu0 %v5708_v43  ;;  %s6640_s8 = sld [smem:[#allocation14_spill]]  ;;  %s6643_s24 = sld [smem:[#allocation8_spill]]  ;;  %vm1892_vm10 = vcmask 39936   ;;  %vm2054_vm11 = vcmask 1041408  }
  0x67   :  { %v4966_v33 = vld [vmem:[%s5801_s20] ss:$0 sm:$0xff]  ;;  %s6644_s30 = sld [smem:[#allocation20_spill]]  ;;  %s6645_s6 = sld [smem:[#allocation16_spill]]  ;;  %vm6258_vm12 = vmpackc.low %vm2054_vm11, %vm5711_vm6  ;;  %vm2050_vm13 = vcmask 80896   ;;  %vm3043_vm14 = vcmask 1040384  }
  0x68   :  { %v6039_v4 = vld [vmem:[%s5741_s17] sm:$0x3f]  ;;  %s6638_s17 = sld [smem:[#allocation12_spill]]  ;;  %s6646_s12 = sld [smem:[#allocation15_spill]]  ;;  %vm3039_vm15 = vcmask 7168  }
  0x69   :  { %v6047_v5 = vld [vmem:[%s5811_s4] sm:$0xf]  ;;  %s6647_s20 = sld [smem:[#allocation17_spill]]  ;;  %s6649_s4 = sld [smem:[#allocation19_spill]] }
  0x6a   :  { %v6053_v6 = vld [vmem:[%s5806_s27] ss:$0 sm:$0xff]  ;;  %s6648_s27 = sld [smem:[#allocation9_spill]]  ;;  %s6650_s7 = sld [smem:[#allocation18_spill]] }
  0x6b   :  { %s6653_s10 = sld [smem:[#allocation21_spill]]  ;;  %s6654_s11 = sld [smem:[#allocation11_spill]] }
  0x6c   :  { %s6655_s15 = sld [smem:[#allocation10_spill]]  ;;  %s6656_s16 = sld [smem:[#allocation23_spill]] }
  0x6d   :  { %s6657_s18 = sld [smem:[#allocation24_spill]]  ;;  %s6659_s22 = sld [smem:[#allocation25_spill]] }
  0x6e   :  { %s5712_s23 = smov 112   ;;  %s5713_s26 = smov 8  }
  0x6f   :  { %s5714_s1 = smov 16   ;;  %s5715_s28 = smov 4  }
  0x70   :  { %s6660_s2 = sld [smem:[#allocation27_spill]] }
 0x133   :  { %v285_v12 = vpop.f32.mrb[0].mxu0 }
 0x134   :  { %v286_v14 = vadd.f32 %v4959_v11, %v285_v12  ;;  %v5183_v15 = vpop.f32.mrb[1].mxu0 }
 0x135   :  { %v6061_v15 = vld [vmem:[%s5821_s14] ss:$0 sm:$0xff]  ;;  %s6641_s14 = sld [smem:[#allocation13_spill]] }
 0x136   :  { %v5188_v16 = vpop.f32.mrb[0].mxu1  ;;  %v5975_v17 = vmax.f32 %v286_v14, 0.0 }
 0x137   :  { %v379_v18 = vadd.f32 %v5188_v16, %v4962_v13  ;;  %v373_v19 = vpop.f32.mrb[1].mxu1 }
 0x138   :  { %v374_v21 = vadd.f32 %v4962_v13, %v373_v19  ;;  %5194 = vmatprep.subr.msk.mxu1 %vm303_vm3, %v5975_v17 }
 0x139   :  { %5195 = vmatpush3.msk.msra.mxu1 %vm303_vm3, %v5975_v17  ;;  %v383_v23 = vmax.f32 %v379_v18, 0.0 }
 0x13a   :  { %v382_v24 = vmax.f32 %v374_v21, 0.0  ;;  %5197 = vmatmul.mubr.msk.f32.vlgmr.msra.gmra.mrb[2].mxu1 %vm296_vm4, %v5978_v20  ;;  %5206 = vmatprep.subr.mxu1 %v5701_v2 }
 0x13b   :  { %5207 = vmatpush3.msk.msra.mxu1 %vm215_vm0, %v5983_v22  ;;  %5208 = vmatprep.mubr.msk.f32.mxu1 %vm5702_vm2, %v5701_v2  ;;  %v4998_v1 = vld [vmem:[%s6641_s14] ss:$0 sm:$0xff]  ;;  %s6666_s14 = sld [smem:[#allocation33_spill]] }
 0x13c   :  { %5191 = vmatprep.mubr.msk.f32.mxu0 %vm390_vm5, %v382_v24 }
 0x13d   :  { %5192 = vmatmul.mubr.msk.f32.vlgmr.msra.gmra.mrb[2].mxu0 %vm390_vm5, %v383_v23 }
 0x13e   :  { %5209 = vmatmul.mubr.msk.f32.vlgmr.msra.gmra.mrb[4].mxu1 %vm211_vm1, %v5975_v17  ;;  %5203 = vmatprep.mubr.msk.f32.mxu0 %vm5702_vm2, %v5701_v2 }
 0x13f   :  { %5218 = vmatprep.mubr.msk.f32.mxu1 %vm296_vm4, %v5966_v7 }
 0x20d   :  { %v5198_v25 = vpop.f32.mrb[2].mxu1 }
 0x20e   :  { %593 = vperm.xlu1 %5538, %v5198_v25   ;;  %573 = vperm.xlu0 %5537, %v5198_v25   ;;  %v547_v26 = vpop.f32.mrb[3].mxu1 }
 0x210   :  { %v5193_v27 = vpop.f32.mrb[2].mxu0 }
 0x211   :  { %v6002_v28 = vpop.f32.mrb[4].mxu1  ;;  %v463_v29 = vpop.f32.mrb[3].mxu0  ;;  %v6011_v34 = vadd.f32 %v5193_v27, %v4966_v33 }
 0x212   :  { %589 = vperm.xlu1 %5538, %v547_v26   ;;  %569 = vperm.xlu0 %5537, %v547_v26   ;;  %v5210_v30 = vpop.f32.mrb[5].mxu1  ;;  %v6014_v38 = vadd.f32 %v4966_v33, %v463_v29 }
 0x216   :  { %5540 = vset.pattern.permute.xlu1 %v5705_v31  ;;  %5539 = vset.pattern.permute.xlu0 %v5705_v31 }
 0x217   :  { %613 = vperm.xlu1 %5540, %v5198_v25   ;;  %609 = vperm.xlu0 %5539, %v547_v26  }
 0x21b   :  { %5542 = vset.pattern.permute.xlu1 %v5706_v32  ;;  %5541 = vset.pattern.permute.xlu0 %v5706_v32 }
 0x21c   :  { %558 = vperm.xlu1 %5542, %v547_v26   ;;  %563 = vperm.xlu0 %5541, %v5198_v25  }
 0x220   :  { %5543 = vset.pattern.permute.xlu1 %v5704_v10  ;;  %5544 = vset.pattern.permute.xlu0 %v5704_v10 }
 0x28d   :  { %v594_v35 = vpop.permute.xlu1 %593  ;;  %v574_v36 = vpop.permute.xlu0 %573 }
 0x28e   :  { %v577_v37 = vmul.f32 %v574_v36, %v6011_v34  ;;  %v597_v41 = vmul.f32 %v594_v35, %v6011_v34 }
 0x290   :  { %582 = vrot.lane.b32.xlu1 %v577_v37, %s5707_s0 }
 0x291   :  { %v590_v39 = vpop.permute.xlu1 %589  ;;  %v570_v40 = vpop.permute.xlu0 %569 }
 0x292   :  { %v596_v42 = vmul.f32 %v590_v39, %v6014_v38  ;;  %v576_v44 = vmul.f32 %v570_v40, %v6014_v38 }
 0x294   :  { %602 = vrot.lane.b32.xlu1 %v597_v41, %s5709_s9  ;;  %600 = vrot.lane.b32.xlu0 %v596_v42, %s5709_s9 }
 0x296   :  { %v610_v45 = vpop.permute.xlu0 %609  ;;  %v614_v46 = vpop.permute.xlu1 %613 }
 0x297   :  { %v616_v47 = vmul.f32 %v610_v45, %v6014_v38  ;;  %v617_v48 = vmul.f32 %v614_v46, %v6011_v34 }
 0x298   :  { %580 = vrot.lane.b32.xlu1 %v576_v44, %s5707_s0 }
 0x299   :  { %620 = vrot.lane.b32.xlu0 %v616_v47, %s5710_s13 }
 0x29b   :  { %v559_v49 = vpop.permute.xlu1 %558  ;;  %v564_v51 = vpop.permute.xlu0 %563 }
 0x29c   :  { %622 = vrot.lane.b32.xlu1 %v617_v48, %s5710_s13  ;;  %v566_v54 = vmul.f32 %v559_v49, %v6014_v38  ;;  %v567_v55 = vmul.f32 %v564_v51, %v6011_v34 }
 0x302   :  { %v583_v50 = vpop.permute.xlu1 %582 }
 0x303   :  { %v587_v57 = vadd.f32 %v583_v50, %v567_v55 }
 0x306   :  { %v603_v52 = vpop.permute.xlu1 %602  ;;  %v601_v53 = vpop.permute.xlu0 %600 }
 0x307   :  { %v607_v59 = vadd.f32 %v603_v52, %v587_v57 }
 0x30a   :  { %v581_v56 = vpop.permute.xlu1 %580 }
 0x30b   :  { %v586_v58 = vadd.f32 %v581_v56, %v566_v54  ;;  %v621_v61 = vpop.permute.xlu0 %620 }
 0x30d   :  { %v606_v60 = vadd.f32 %v601_v53, %v586_v58 }
 0x30e   :  { %v623_v62 = vpop.permute.xlu1 %622 }
 0x30f   :  { %v626_v63 = vadd.f32 %v621_v61, %v606_v60  ;;  %v627_v0 = vadd.f32 %v623_v62, %v607_v59 }
 0x311   :  { %v5449_v3 = vpack.c.bf16 %v627_v0, %v626_v63 }
 0x313   :  { %5451 = vmatpush3.bf16.msk.msra.mxu0 %vm6032_vm7, %v5449_v3 }
 0x314   :  { %5211 = vmatprep.subr.mxu0 %v5701_v2 }
 0x316   :  { %5204 = vmatmul.mubr.msk.f32.vlgmr.msra.gmra.mrb[4].mxu0 %vm628_vm8, %v6039_v4 }
 0x317   :  { %5213 = vmatprep.mubr.msk.f32.mxu0 %vm5702_vm2, %v5701_v2  ;;  %5212 = vmatpush3.msk.msra.mxu0 %vm215_vm0, %v6047_v5 }
 0x318   :  { %5452 = vmatprep.subr.bf16.mxu0 %v5708_v43 }
 0x3e9   :  { %v701_v8 = vpop.f32.mrb[4].mxu0 }
 0x3ea   :  { %v702_v11 = vadd.f32 %v701_v8, %v5975_v17  ;;  %v5205_v12 = vpop.f32.mrb[5].mxu0 }
 0x3ec   :  { %v711_v13 = vadd.f32 %v6053_v6, %v702_v11 }
 0x3ee   :  { %v712_v14 = vmax.f32 %v711_v13, 0.0 }
 0x3f0   :  { %5214 = vmatmul.mubr.msk.f32.vlgmr.msra.gmra.mrb[6].mxu0 %vm211_vm1, %v712_v14 }
 0x3f1   :  { %5225 = vmatprep.mubr.msk.f32.mxu0 %vm5702_vm2, %v5701_v2 }
 0x4c3   :  { %v860_v16 = vpop.f32.mrb[6].mxu0 }
 0x4c4   :  { %v861_v18 = vadd.f32 %v860_v16, %v6002_v28  ;;  %v5215_v19 = vpop.f32.mrb[7].mxu0 }
 0x4c6   :  { %v6065_v21 = vadd.f32 %v6061_v15, %v861_v18 }
 0x4c8   :  { %5216 = vmatprep.subr.msk.mxu1 %vm303_vm3, %v6065_v21 }
 0x4c9   :  { %5217 = vmatpush3.msk.msra.mxu1 %vm303_vm3, %v6065_v21 }
 0x4ca   :  { %5219 = vmatmul.mubr.msk.f32.vlgmr.msra.gmra.mrb[6].mxu1 %vm296_vm4, %v5978_v20  ;;  %5228 = vmatprep.subr.mxu1 %v5701_v2 }
 0x4cb   :  { %5229 = vmatpush3.msk.msra.mxu1 %vm215_vm0, %v5983_v22  ;;  %5230 = vmatprep.mubr.msk.f32.mxu1 %vm5702_vm2, %v5701_v2 }
 0x4ce   :  { %5231 = vmatmul.mubr.msk.f32.vlgmr.msra.gmra.mrb[8].mxu1 %vm211_vm1, %v6065_v21 }
 0x4cf   :  { %5240 = vmatprep.mubr.msk.f32.mxu1 %vm296_vm4, %v5966_v7 }
 0x59d   :  { %v5220_v17 = vpop.f32.mrb[6].mxu1 }
 0x59e   :  { %966 = vperm.xlu1 %5543, %v5220_v17   ;;  %v940_v23 = vpop.f32.mrb[7].mxu1 }
 0x59f   :  { %962 = vperm.xlu0 %5544, %v940_v23  }
 0x5a1   :  { %v6082_v24 = vpop.f32.mrb[8].mxu1 }
 0x5a2   :  { %5546 = vset.pattern.permute.xlu1 %v5703_v9  ;;  %v5232_v25 = vpop.f32.mrb[9].mxu1 }
 0x5a3   :  { %982 = vperm.xlu1 %5546, %v940_v23   ;;  %5545 = vset.pattern.permute.xlu0 %v5703_v9 }
 0x5a4   :  { %986 = vperm.xlu0 %5545, %v5220_v17  }
 0x5a7   :  { %5547 = vset.pattern.permute.xlu1 %v5705_v31 }
 0x5a8   :  { %1002 = vperm.xlu1 %5547, %v940_v23   ;;  %5549 = vset.pattern.permute.xlu0 %v5706_v32 }
 0x5a9   :  { %951 = vperm.xlu0 %5549, %v940_v23  }
 0x5ac   :  { %1006 = vperm.xlu1 %5547, %v5220_v17  }
 0x5ad   :  { %5550 = vset.pattern.permute.xlu0 %v5704_v10 }
 0x5b0   :  { %5548 = vset.pattern.permute.xlu1 %v5706_v32 }
 0x5b1   :  { %956 = vperm.xlu1 %5548, %v5220_v17  }
 0x5b5   :  { %5551 = vset.pattern.permute.xlu1 %v5703_v9 }
 0x61d   :  { %v967_v7 = vpop.permute.xlu1 %966 }
 0x61e   :  { %v970_v26 = vmul.f32 %v967_v7, %v6011_v34  ;;  %v963_v27 = vpop.permute.xlu0 %962  ;;  %v1620_v7 = vld [vmem:[%s6638_s17] sm:$0xf]  ;;  %s6663_s17 = sld [smem:[#allocation29_spill]] }
 0x61f   :  { %v969_v28 = vmul.f32 %v963_v27, %v6014_v38 }
 0x620   :  { %975 = vrot.lane.b32.xlu0 %v970_v26, %s5707_s0  ;;  %v6159_v26 = vld [vmem:[%s6639_s3] sm:$0x1f]  ;;  %s6664_s3 = sld [smem:[#allocation30_spill]] }
 0x621   :  { %973 = vrot.lane.b32.xlu1 %v969_v28, %s5707_s0 }
 0x622   :  { %v983_v29 = vpop.permute.xlu1 %982 }
 0x623   :  { %v989_v30 = vmul.f32 %v983_v29, %v6014_v38  ;;  %v987_v33 = vpop.permute.xlu0 %986 }
 0x624   :  { %v990_v35 = vmul.f32 %v987_v33, %v6011_v34 }
 0x625   :  { %993 = vrot.lane.b32.xlu1 %v989_v30, %s5709_s9 }
 0x626   :  { %995 = vrot.lane.b32.xlu0 %v990_v35, %s5709_s9 }
 0x627   :  { %v1003_v36 = vpop.permute.xlu1 %1002 }
 0x628   :  { %v1009_v37 = vmul.f32 %v1003_v36, %v6014_v38  ;;  %v952_v44 = vpop.permute.xlu0 %951 }
 0x629   :  { %v959_v47 = vmul.f32 %v952_v44, %v6014_v38 }
 0x62a   :  { %1013 = vrot.lane.b32.xlu1 %v1009_v37, %s5710_s13 }
 0x62b   :  { %v1007_v39 = vpop.permute.xlu1 %1006 }
 0x62c   :  { %v1010_v40 = vmul.f32 %v1007_v39, %v6011_v34 }
 0x62e   :  { %1015 = vrot.lane.b32.xlu0 %v1010_v40, %s5710_s13 }
 0x630   :  { %v957_v41 = vpop.permute.xlu1 %956 }
 0x631   :  { %v960_v48 = vmul.f32 %v957_v41, %v6011_v34 }
 0x692   :  { %v976_v45 = vpop.permute.xlu0 %975 }
 0x693   :  { %v974_v42 = vpop.permute.xlu1 %973  ;;  %v980_v50 = vadd.f32 %v976_v45, %v960_v48 }
 0x694   :  { %v979_v51 = vadd.f32 %v974_v42, %v959_v47 }
 0x697   :  { %v994_v46 = vpop.permute.xlu1 %993 }
 0x698   :  { %v996_v49 = vpop.permute.xlu0 %995  ;;  %v999_v53 = vadd.f32 %v994_v46, %v979_v51 }
 0x699   :  { %v1000_v54 = vadd.f32 %v996_v49, %v980_v50 }
 0x69c   :  { %v1014_v52 = vpop.permute.xlu1 %1013 }
 0x69d   :  { %v1019_v56 = vadd.f32 %v1014_v52, %v999_v53 }
 0x6a0   :  { %v1016_v55 = vpop.permute.xlu0 %1015 }
 0x6a1   :  { %v1020_v57 = vadd.f32 %v1016_v55, %v1000_v54 }
 0x6a3   :  { %v5453_v58 = vpack.c.bf16 %v1020_v57, %v1019_v56  ;;  %v1615_v57 = vld [vmem:[%s6642_s19] sm:$0xff] }
 0x6a5   :  { %5455 = vmatpush3.bf16.msk.msra.mxu0 %vm6032_vm7, %v5453_v58 }
 0x6a6   :  { %5233 = vmatprep.subr.mxu0 %v5701_v2 }
 0x6a8   :  { %5226 = vmatmul.mubr.msk.f32.vlgmr.msra.gmra.mrb[8].mxu0 %vm628_vm8, %v6039_v4 }
 0x6a9   :  { %5234 = vmatpush3.msk.msra.mxu0 %vm215_vm0, %v6047_v5  ;;  %5235 = vmatprep.mubr.msk.f32.mxu0 %vm5702_vm2, %v5701_v2 }
 0x6aa   :  { %5456 = vmatprep.subr.bf16.mxu0 %v5708_v43 }
 0x77b   :  { %v1090_v59 = vpop.f32.mrb[8].mxu0 }
 0x77c   :  { %v1091_v60 = vadd.f32 %v1090_v59, %v6065_v21  ;;  %v5227_v61 = vpop.f32.mrb[9].mxu0  ;;  %v1616_v59 = vld [vmem:[%s6642_s19 + $0x8] sm:$0x3]  ;;  %s6667_s19 = sld [smem:[#allocation32_spill]] }
 0x77d   :  { %v6207_v61 = vld [vmem:[%s6644_s30] sm:$0xf] }
 0x77e   :  { %v1094_v62 = vadd.f32 %v6053_v6, %v1091_v60  ;;  %v6195_v60 = vld [vmem:[%s6643_s24] sm:$0xff] }
 0x780   :  { %v1095_v63 = vmax.f32 %v1094_v62, 0.0  ;;  %v1624_v62 = vld [vmem:[%s6645_s6] sm:$0xff] }
 0x782   :  { %5236 = vmatmul.mubr.msk.f32.vlgmr.msra.gmra.mrb[10].mxu0 %vm211_vm1, %v1095_v63 }
 0x783   :  { %5247 = vmatprep.mubr.msk.f32.mxu0 %vm5702_vm2, %v5701_v2 }
 0x855   :  { %v1237_v0 = vpop.f32.mrb[10].mxu0 }
 0x856   :  { %v1238_v3 = vadd.f32 %v1237_v0, %v6082_v24  ;;  %v5237_v8 = vpop.f32.mrb[11].mxu0 }
 0x857   :  { %v5001_v8 = vld [vmem:[%s6646_s12] ss:$0 sm:$0xff] }
 0x858   :  { %v6122_v11 = vadd.f32 %v6061_v15, %v1238_v3 }
 0x85a   :  { %5238 = vmatprep.subr.msk.mxu1 %vm303_vm3, %v6122_v11 }
 0x85b   :  { %5239 = vmatpush3.msk.msra.mxu1 %vm303_vm3, %v6122_v11 }
 0x85c   :  { %5241 = vmatmul.mubr.msk.f32.vlgmr.msra.gmra.mrb[10].mxu1 %vm296_vm4, %v5978_v20  ;;  %5250 = vmatprep.subr.mxu1 %v5701_v2 }
 0x85d   :  { %5251 = vmatpush3.msk.msra.mxu1 %vm215_vm0, %v5983_v22  ;;  %5252 = vmatprep.mubr.msk.f32.mxu1 %vm5702_vm2, %v5701_v2 }
 0x85e   :  { %5260 = vmatprep.subr.mxu1 %v5701_v2 }
 0x860   :  { %5253 = vmatmul.mubr.msk.f32.vlgmr.msra.gmra.mrb[12].mxu1 %vm211_vm1, %v6122_v11 }
 0x861   :  { %5262 = vmatprep.mubr.msk.f32.mxu1 %vm5702_vm2, %v5701_v2  ;;  %5261 = vmatpush3.msk.msra.mxu1 %vm215_vm0, %v1620_v7 }
 0x862   :  { %5270 = vmatprep.subr.mxu1 %v1624_v62 }
 0x864   :  { %5263 = vmatmul.mubr.msk.f32.vlgmr.msra.gmra.mrb[14].mxu1 %vm211_vm1, %v6159_v26 }
 0x865   :  { %5271 = vmatpush3.msra.mxu1 %v1624_v62  ;;  %v6279_v62 = vld [vmem:[%s6650_s7] ss:$0 sm:$0xff] }
 0x866   :  { %5460 = vmatprep.subr.bf16.mxu1 %v5708_v43 }
 0x92f   :  { %v5242_v12 = vpop.f32.mrb[10].mxu1 }
 0x930   :  { %1357 = vperm.xlu1 %5551, %v5242_v12   ;;  %1337 = vperm.xlu0 %5550, %v5242_v12   ;;  %v1311_v20 = vpop.f32.mrb[11].mxu1 }
 0x933   :  { %v6140_v13 = vpop.f32.mrb[12].mxu1 }
 0x934   :  { %5552 = vset.pattern.permute.xlu1 %v5704_v10  ;;  %5554 = vset.pattern.permute.xlu0 %v5705_v31  ;;  %v5254_v22 = vpop.f32.mrb[13].mxu1 }
 0x935   :  { %1373 = vperm.xlu0 %5554, %v1311_v20   ;;  %1333 = vperm.xlu1 %5552, %v1311_v20  }
 0x939   :  { %5556 = vset.pattern.permute.xlu0 %v5706_v32  ;;  %5553 = vset.pattern.permute.xlu1 %v5703_v9 }
 0x93a   :  { %1327 = vperm.xlu0 %5556, %v5242_v12   ;;  %1353 = vperm.xlu1 %5553, %v1311_v20  }
 0x93e   :  { %5555 = vset.pattern.permute.xlu1 %v5705_v31  ;;  %5559 = vset.pattern.permute.xlu0 %v5704_v10 }
 0x93f   :  { %1377 = vperm.xlu1 %5555, %v5242_v12  }
 0x943   :  { %5557 = vset.pattern.permute.xlu1 %v5706_v32 }
 0x944   :  { %1322 = vperm.xlu1 %5557, %v1311_v20  }
 0x948   :  { %5558 = vset.pattern.permute.xlu1 %v5704_v10 }
 0x9af   :  { %v1358_v14 = vpop.permute.xlu1 %1357  ;;  %v1338_v16 = vpop.permute.xlu0 %1337 }
 0x9b0   :  { %v1341_v18 = vmul.f32 %v1338_v16, %v6011_v34  ;;  %v1361_v19 = vmul.f32 %v1358_v14, %v6011_v34 }
 0x9b2   :  { %1346 = vrot.lane.b32.xlu1 %v1341_v18, %s5707_s0 }
 0x9b4   :  { %v1334_v21 = vpop.permute.xlu1 %1333  ;;  %v1374_v25 = vpop.permute.xlu0 %1373 }
 0x9b5   :  { %v1340_v17 = vmul.f32 %v1334_v21, %v6014_v38  ;;  %v1380_v27 = vmul.f32 %v1374_v25, %v6014_v38 }
 0x9b6   :  { %1366 = vrot.lane.b32.xlu1 %v1361_v19, %s5709_s9 }
 0x9b9   :  { %v1354_v23 = vpop.permute.xlu1 %1353  ;;  %v1328_v36 = vpop.permute.xlu0 %1327 }
 0x9ba   :  { %v1360_v24 = vmul.f32 %v1354_v23, %v6014_v38  ;;  %1344 = vrot.lane.b32.xlu1 %v1340_v17, %s5707_s0  ;;  %v1331_v41 = vmul.f32 %v1328_v36, %v6011_v34 }
 0x9bc   :  { %1364 = vrot.lane.b32.xlu0 %v1360_v24, %s5709_s9  ;;  %v5005_v24 = vld [vmem:[%s6647_s20] ss:$0 sm:$0xff] }
 0x9be   :  { %v1378_v28 = vpop.permute.xlu1 %1377 }
 0x9bf   :  { %v1381_v29 = vmul.f32 %v1378_v28, %v6011_v34  ;;  %v1622_v34 = vld [vmem:[%s6640_s8] sm:$0x3f]  ;;  %s6665_s8 = sld [smem:[#allocation31_spill]] }
 0x9c0   :  { %1384 = vrot.lane.b32.xlu0 %v1380_v27, %s5710_s13 }
 0x9c1   :  { %1386 = vrot.lane.b32.xlu1 %v1381_v29, %s5710_s13 }
 0x9c3   :  { %v1323_v30 = vpop.permute.xlu1 %1322 }
 0x9c4   :  { %v1330_v37 = vmul.f32 %v1323_v30, %v6014_v38  ;;  %v1708_v38 = vpop.f32.mrb[14].mxu1 }
 0x9c5   :  { %v5264_v52 = vpop.f32.mrb[15].mxu1  ;;  %v1709_v56 = vadd.f32 %v4998_v1, %v1708_v38 }
 0x9c7   :  { %v6186_v58 = vmax.f32 %v1709_v56, 0.0 }
 0xa24   :  { %v1347_v33 = vpop.permute.xlu1 %1346 }
 0xa25   :  { %v1351_v44 = vadd.f32 %v1347_v33, %v1331_v41 }
 0xa28   :  { %v1367_v35 = vpop.permute.xlu1 %1366 }
 0xa29   :  { %v1371_v46 = vadd.f32 %v1367_v35, %v1351_v44 }
 0xa2c   :  { %v1345_v39 = vpop.permute.xlu1 %1344 }
 0xa2d   :  { %v1350_v40 = vadd.f32 %v1345_v39, %v1330_v37 }
 0xa2e   :  { %v1365_v42 = vpop.permute.xlu0 %1364 }
 0xa2f   :  { %v1370_v45 = vadd.f32 %v1365_v42, %v1350_v40 }
 0xa32   :  { %v1385_v47 = vpop.permute.xlu0 %1384 }
 0xa33   :  { %v1390_v48 = vadd.f32 %v1385_v47, %v1370_v45  ;;  %v1387_v49 = vpop.permute.xlu1 %1386 }
 0xa34   :  { %v1391_v50 = vadd.f32 %v1387_v49, %v1371_v46 }
 0xa36   :  { %v5457_v51 = vpack.c.bf16 %v1391_v50, %v1390_v48 }
 0xa38   :  { %5459 = vmatpush3.bf16.msk.msra.mxu0 %vm6032_vm7, %v5457_v51 }
 0xa39   :  { %5255 = vmatprep.subr.mxu0 %v5701_v2 }
 0xa3b   :  { %5248 = vmatmul.mubr.msk.f32.vlgmr.msra.gmra.mrb[12].mxu0 %vm628_vm8, %v6039_v4 }
 0xa3c   :  { %5256 = vmatpush3.msk.msra.mxu0 %vm215_vm0, %v6047_v5  ;;  %5257 = vmatprep.mubr.msk.f32.mxu0 %vm5702_vm2, %v5701_v2 }
 0xa3d   :  { %5265 = vmatprep.subr.msk.mxu0 %vm303_vm3, %v1622_v34 }
 0xb0e   :  { %v1461_v53 = vpop.f32.mrb[12].mxu0 }
 0xb0f   :  { %v1462_v54 = vadd.f32 %v1461_v53, %v6122_v11  ;;  %v5249_v55 = vpop.f32.mrb[13].mxu0 }
 0xb11   :  { %v1465_v4 = vadd.f32 %v6053_v6, %v1462_v54  ;;  %v6203_v6 = vld [vmem:[%s6643_s24 + $0x8] sm:$0x3]  ;;  %s5717_s24 = smov [#allocation3]  }
 0xb12   :  { %s4906_s30 = sshll.u32 %s5717_s24, 4  ;;  %s4907_s30 = int_to_ptr.vmem [resolvable:$true] %s4906_s30 }
 0xb13   :  { %v1466_v5 = vmax.f32 %v1465_v4, 0.0  ;;  %s5636_s6 = scalar_lea.vmem %s4907_s30, 32  ;;  %p5637_p1 = scmp.lt.s32.totalorder %s4907_s30, %s4907_s30 }
 0xb15   :  { %5258 = vmatmul.mubr.msk.f32.vlgmr.msra.gmra.mrb[14].mxu0 %vm211_vm1, %v1466_v5 }
 0xb16   :  { %5266 = vmatpush3.msk.msra.mxu0 %vm303_vm3, %v1622_v34  ;;  %5267 = vmatprep.mubr.msk.f32.mxu0 %vm296_vm4, %v1615_v57  ;;  %v6265_v57 = vld [vmem:[%s6648_s27] sm:$0x1f] }
 0xb17   :  { %5275 = vmatprep.subr.msk.mxu0 %vm1899_vm9, %v6186_v58 }
 0xb19   :  { %5268 = vmatmul.mubr.msk.f32.vlgmr.msra.gmra.mrb[16].mxu0 %vm296_vm4, %v1616_v59  ;;  %v6273_v59 = vld [vmem:[%s6649_s4] sm:$0xf] }
 0xb1a   :  { %5276 = vmatpush3.msk.msra.mxu0 %vm1899_vm9, %v6186_v58  ;;  %5277 = vmatprep.mubr.msk.f32.mxu0 %vm1892_vm10, %v6195_v60 }
 0xb1b   :  { %5287 = vmatprep.subr.mxu0 %v5701_v2 }
 0xb1d   :  { %5278 = vmatmul.mubr.msk.f32.vlgmr.msra.gmra.mrb[18].mxu0 %vm1892_vm10, %v6203_v6 }
 0xb1e   :  { %5288 = vmatpush3.msk.msra.mxu0 %vm215_vm0, %v6207_v61  ;;  %5289 = vmatprep.mubr.msk.f32.mxu0 %vm5702_vm2, %v5701_v2 }
 0xb21   :  { %5290 = vmatmul.mubr.msk.f32.vlgmr.msra.gmra.mrb[20].mxu0 %vm211_vm1, %v6186_v58 }
 0xb22   :  { %5299 = vmatprep.mubr.msk.f32.mxu0 %vm1892_vm10, %v6195_v60 }
 0xbe8   :  { %v1608_v63 = vpop.f32.mrb[14].mxu0 }
 0xbe9   :  { %v6222_v0 = vadd.f32 %v1608_v63, %v6140_v13  ;;  %v5259_v3 = vpop.f32.mrb[15].mxu0 }
 0xbec   :  { %v5269_v11 = vpop.f32.mrb[16].mxu0 }
 0xbed   :  { %v1800_v12 = vadd.f32 %v5269_v11, %v5001_v8  ;;  %v1794_v20 = vpop.f32.mrb[17].mxu0 }
 0xbee   :  { %v1795_v22 = vadd.f32 %v5001_v8, %v1794_v20  ;;  %v6287_v20 = vld [vmem:[%s6653_s10] ss:$0 sm:$0xff] }
 0xbef   :  { %v1804_v18 = vmax.f32 %v1800_v12, 0.0 }
 0xbf0   :  { %v1803_v14 = vmax.f32 %v1795_v22, 0.0  ;;  %v5279_v16 = vpop.f32.mrb[18].mxu0 }
 0xbf1   :  { %1995 = vperm.xlu1 %5558, %v5279_v16   ;;  %v1969_v19 = vpop.f32.mrb[19].mxu0 }
 0xbf2   :  { %5272 = vmatprep.mubr.msk.f32.mxu1 %vm390_vm5, %v1803_v14  ;;  %1991 = vperm.xlu0 %5559, %v1969_v19  }
 0xbf3   :  { %5273 = vmatmul.mubr.msk.f32.vlgmr.msra.gmra.mrb[16].mxu1 %vm390_vm5, %v1804_v18 }
 0xbf4   :  { %v6227_v21 = vpop.f32.mrb[20].mxu0  ;;  %5284 = vmatprep.mubr.msk.f32.mxu1 %vm5702_vm2, %v5701_v2 }
 0xbf5   :  { %5561 = vset.pattern.permute.xlu1 %v5703_v9  ;;  %v5291_v13 = vpop.f32.mrb[21].mxu0 }
 0xbf6   :  { %2011 = vperm.xlu1 %5561, %v1969_v19   ;;  %5560 = vset.pattern.permute.xlu0 %v5703_v9 }
 0xbf7   :  { %2015 = vperm.xlu0 %5560, %v5279_v16  }
 0xbfa   :  { %5562 = vset.pattern.permute.xlu1 %v5705_v31 }
 0xbfb   :  { %2031 = vperm.xlu1 %5562, %v1969_v19   ;;  %5564 = vset.pattern.permute.xlu0 %v5706_v32 }
 0xbfc   :  { %1980 = vperm.xlu0 %5564, %v1969_v19  }
 0xbff   :  { %2035 = vperm.xlu1 %5562, %v5279_v16  }
 0xc00   :  { %5565 = vset.pattern.permute.xlu0 %v5704_v10 }
 0xc03   :  { %5563 = vset.pattern.permute.xlu1 %v5706_v32 }
 0xc04   :  { %1985 = vperm.xlu1 %5563, %v5279_v16  }
 0xc08   :  { %5566 = vset.pattern.permute.xlu1 %v5703_v9 }
 0xc70   :  { %v1996_v17 = vpop.permute.xlu1 %1995 }
 0xc71   :  { %v1992_v25 = vpop.permute.xlu0 %1991 }
 0xc75   :  { %v2012_v23 = vpop.permute.xlu1 %2011 }
 0xc76   :  { %v2016_v36 = vpop.permute.xlu0 %2015 }
 0xc7a   :  { %v2032_v33 = vpop.permute.xlu1 %2031 }
 0xc7b   :  { %v1981_v44 = vpop.permute.xlu0 %1980 }
 0xc7e   :  { %v2036_v40 = vpop.permute.xlu1 %2035 }
 0xc83   :  { %v1986_v45 = vpop.permute.xlu1 %1985 }
 0xcc6   :  { %v5274_v7 = vpop.f32.mrb[16].mxu1 }
 0xcc7   :  { %v6239_v27 = vadd.f32 %v5274_v7, %v5005_v24  ;;  %v1883_v28 = vpop.f32.mrb[17].mxu1 }
 0xcc8   :  { %v6241_v29 = vadd.f32 %v5005_v24, %v1883_v28 }
 0xcc9   :  { %v1999_v30 = vmul.f32 %v1996_v17, %v6239_v27  ;;  %v2019_v37 = vmul.f32 %v2016_v36, %v6239_v27  ;;  %v2039_v41 = vmul.f32 %v2036_v40, %v6239_v27  ;;  %v1989_v48 = vmul.f32 %v1986_v45, %v6239_v27 }
 0xcca   :  { %v1998_v35 = vmul.f32 %v1992_v25, %v6241_v29  ;;  %v2018_v39 = vmul.f32 %v2012_v23, %v6241_v29  ;;  %v2038_v42 = vmul.f32 %v2032_v33, %v6241_v29  ;;  %v1988_v49 = vmul.f32 %v1981_v44, %v6241_v29 }
 0xccb   :  { %2004 = vrot.lane.b32.xlu0 %v1999_v30, %s5707_s0 }
 0xccc   :  { %2002 = vrot.lane.b32.xlu1 %v1998_v35, %s5707_s0 }
 0xccf   :  { %2024 = vrot.lane.b32.xlu0 %v2019_v37, %s5709_s9 }
 0xcd0   :  { %2022 = vrot.lane.b32.xlu1 %v2018_v39, %s5709_s9 }
 0xcd3   :  { %2044 = vrot.lane.b32.xlu0 %v2039_v41, %s5710_s13 }
 0xcd4   :  { %2042 = vrot.lane.b32.xlu1 %v2038_v42, %s5710_s13 }
 0xd3d   :  { %v2005_v46 = vpop.permute.xlu0 %2004 }
 0xd3e   :  { %v2003_v47 = vpop.permute.xlu1 %2002  ;;  %v2009_v51 = vadd.f32 %v2005_v46, %v1989_v48 }
 0xd3f   :  { %v2008_v38 = vadd.f32 %v2003_v47, %v1988_v49 }
 0xd41   :  { %v2025_v50 = vpop.permute.xlu0 %2024 }
 0xd42   :  { %v2023_v34 = vpop.permute.xlu1 %2022  ;;  %v2029_v52 = vadd.f32 %v2025_v50, %v2009_v51 }
 0xd43   :  { %v2028_v1 = vadd.f32 %v2023_v34, %v2008_v38 }
 0xd45   :  { %v2045_v53 = vpop.permute.xlu0 %2044 }
 0xd46   :  { %v2049_v54 = vadd.f32 %v2045_v53, %v2029_v52  ;;  %v2043_v55 = vpop.permute.xlu1 %2042 }
 0xd47   :  { %v2048_v56 = vadd.f32 %v2043_v55, %v2028_v1 }
 0xd49   :  { %v5461_v5 = vpack.c.bf16 %v2049_v54, %v2048_v56 }
 0xd4b   :  { %5463 = vmatpush3.bf16.msk.msra.mxu1 %vm6258_vm12, %v5461_v5 }
 0xd4c   :  { %5292 = vmatprep.subr.mxu1 %v5701_v2 }
 0xd4e   :  { %5285 = vmatmul.mubr.msk.f32.vlgmr.msra.gmra.mrb[18].mxu1 %vm2050_vm13, %v6265_v57 }
 0xd4f   :  { %5294 = vmatprep.mubr.msk.f32.mxu1 %vm5702_vm2, %v5701_v2  ;;  %5293 = vmatpush3.msk.msra.mxu1 %vm215_vm0, %v6273_v59 }
 0xd50   :  { %5464 = vmatprep.subr.bf16.mxu1 %v5708_v43 }
 0xe21   :  { %v2124_v63 = vpop.f32.mrb[18].mxu1 }
 0xe22   :  { %v2125_v3 = vadd.f32 %v2124_v63, %v6186_v58  ;;  %v5286_v8 = vpop.f32.mrb[19].mxu1 }
 0xe24   :  { %v2134_v11 = vadd.f32 %v6279_v62, %v2125_v3 }
 0xe26   :  { %v2135_v12 = vmax.f32 %v2134_v11, 0.0 }
 0xe28   :  { %5295 = vmatmul.mubr.msk.f32.vlgmr.msra.gmra.mrb[20].mxu1 %vm211_vm1, %v2135_v12 }
 0xe29   :  { %5306 = vmatprep.mubr.msk.f32.mxu1 %vm5702_vm2, %v5701_v2 }
 0xefb   :  { %v2283_v22 = vpop.f32.mrb[20].mxu1 }
 0xefc   :  { %v2284_v14 = vadd.f32 %v2283_v22, %v6227_v21  ;;  %v5296_v16 = vpop.f32.mrb[21].mxu1 }
 0xefe   :  { %v6291_v18 = vadd.f32 %v6287_v20, %v2284_v14 }
 0xf00   :  { %5297 = vmatprep.subr.msk.mxu0 %vm1899_vm9, %v6291_v18 }
 0xf01   :  { %5298 = vmatpush3.msk.msra.mxu0 %vm1899_vm9, %v6291_v18 }
 0xf02   :  { %5300 = vmatmul.mubr.msk.f32.vlgmr.msra.gmra.mrb[22].mxu0 %vm1892_vm10, %v6203_v6  ;;  %5309 = vmatprep.subr.mxu0 %v5701_v2 }
 0xf03   :  { %5310 = vmatpush3.msk.msra.mxu0 %vm215_vm0, %v6207_v61  ;;  %5311 = vmatprep.mubr.msk.f32.mxu0 %vm5702_vm2, %v5701_v2 }
 0xf06   :  { %5312 = vmatmul.mubr.msk.f32.vlgmr.msra.gmra.mrb[24].mxu0 %vm211_vm1, %v6291_v18 }
 0xf07   :  { %5321 = vmatprep.mubr.msk.f32.mxu0 %vm1892_vm10, %v6195_v60 }
 0xfd5   :  { %v5301_v58 = vpop.f32.mrb[22].mxu0 }
 0xfd6   :  { %2409 = vperm.xlu1 %5566, %v5301_v58   ;;  %2389 = vperm.xlu0 %5565, %v5301_v58   ;;  %v2363_v19 = vpop.f32.mrb[23].mxu0 }
 0xfd9   :  { %v6308_v21 = vpop.f32.mrb[24].mxu0 }
 0xfda   :  { %5567 = vset.pattern.permute.xlu1 %v5704_v10  ;;  %5569 = vset.pattern.permute.xlu0 %v5705_v31  ;;  %v5313_v13 = vpop.f32.mrb[25].mxu0 }
 0xfdb   :  { %2425 = vperm.xlu0 %5569, %v2363_v19   ;;  %2385 = vperm.xlu1 %5567, %v2363_v19  }
 0xfdf   :  { %5571 = vset.pattern.permute.xlu0 %v5706_v32  ;;  %5568 = vset.pattern.permute.xlu1 %v5703_v9 }
 0xfe0   :  { %2379 = vperm.xlu0 %5571, %v5301_v58   ;;  %2405 = vperm.xlu1 %5568, %v2363_v19  }
 0xfe4   :  { %5570 = vset.pattern.permute.xlu1 %v5705_v31  ;;  %5574 = vset.pattern.permute.xlu0 %v5704_v10 }
 0xfe5   :  { %2429 = vperm.xlu1 %5570, %v5301_v58  }
 0xfe9   :  { %5572 = vset.pattern.permute.xlu1 %v5706_v32 }
 0xfea   :  { %2374 = vperm.xlu1 %5572, %v2363_v19  }
 0xfee   :  { %5573 = vset.pattern.permute.xlu1 %v5704_v10 }
0x1055   :  { %v2410_v60 = vpop.permute.xlu1 %2409  ;;  %v2390_v17 = vpop.permute.xlu0 %2389 }
0x1056   :  { %v2393_v23 = vmul.f32 %v2390_v17, %v6239_v27  ;;  %v2413_v24 = vmul.f32 %v2410_v60, %v6239_v27 }
0x1058   :  { %2398 = vrot.lane.b32.xlu1 %v2393_v23, %s5707_s0 }
0x105a   :  { %v2386_v25 = vpop.permute.xlu1 %2385  ;;  %v2426_v33 = vpop.permute.xlu0 %2425 }
0x105b   :  { %v2392_v7 = vmul.f32 %v2386_v25, %v6241_v29  ;;  %v2432_v10 = vmul.f32 %v2426_v33, %v6241_v29 }
0x105c   :  { %2418 = vrot.lane.b32.xlu1 %v2413_v24, %s5709_s9 }
0x105f   :  { %v2406_v28 = vpop.permute.xlu1 %2405  ;;  %v2380_v41 = vpop.permute.xlu0 %2379 }
0x1060   :  { %v2412_v30 = vmul.f32 %v2406_v28, %v6241_v29  ;;  %2396 = vrot.lane.b32.xlu1 %v2392_v7, %s5707_s0  ;;  %v2383_v46 = vmul.f32 %v2380_v41, %v6239_v27 }
0x1062   :  { %2416 = vrot.lane.b32.xlu0 %v2412_v30, %s5709_s9 }
0x1064   :  { %v2430_v35 = vpop.permute.xlu1 %2429 }
0x1065   :  { %v2433_v36 = vmul.f32 %v2430_v35, %v6239_v27 }
0x1066   :  { %2436 = vrot.lane.b32.xlu0 %v2432_v10, %s5710_s13 }
0x1067   :  { %2438 = vrot.lane.b32.xlu1 %v2433_v36, %s5710_s13 }
0x1069   :  { %v2375_v37 = vpop.permute.xlu1 %2374 }
0x106a   :  { %v2382_v42 = vmul.f32 %v2375_v37, %v6241_v29 }
0x10ca   :  { %v2399_v39 = vpop.permute.xlu1 %2398 }
0x10cb   :  { %v2403_v48 = vadd.f32 %v2399_v39, %v2383_v46 }
0x10ce   :  { %v2419_v40 = vpop.permute.xlu1 %2418 }
0x10cf   :  { %v2423_v50 = vadd.f32 %v2419_v40, %v2403_v48 }
0x10d2   :  { %v2397_v44 = vpop.permute.xlu1 %2396 }
0x10d3   :  { %v2402_v45 = vadd.f32 %v2397_v44, %v2382_v42 }
0x10d4   :  { %v2417_v47 = vpop.permute.xlu0 %2416 }
0x10d5   :  { %v2422_v49 = vadd.f32 %v2417_v47, %v2402_v45 }
0x10d8   :  { %v2437_v51 = vpop.permute.xlu0 %2436 }
0x10d9   :  { %v2442_v34 = vadd.f32 %v2437_v51, %v2422_v49  ;;  %v2439_v38 = vpop.permute.xlu1 %2438  ;;  %v1612_v51 = vadd.f32 %v6061_v15, %v6222_v0 }
0x10da   :  { %v2443_v52 = vadd.f32 %v2439_v38, %v2423_v50  ;;  %v5631_v38 = vld [vmem:[%s5726_s5] sm:$0x3f]  ;;  %s6658_s5 = sld [smem:[#allocation22_spill]] }
0x10dc   :  { %v5465_v1 = vpack.c.bf16 %v2443_v52, %v2442_v34  ;;  %v6421_v52 = vadd.f32 %v5631_v38, %v1612_v51 }
0x10de   :  { %5467 = vmatpush3.bf16.msk.msra.mxu1 %vm6258_vm12, %v5465_v1 }
0x10df   :  { %5314 = vmatprep.subr.mxu1 %v5701_v2 }
0x10e1   :  { %5307 = vmatmul.mubr.msk.f32.vlgmr.msra.gmra.mrb[22].mxu1 %vm2050_vm13, %v6265_v57 }
0x10e2   :  { %5315 = vmatpush3.msk.msra.mxu1 %vm215_vm0, %v6273_v59  ;;  %5316 = vmatprep.mubr.msk.f32.mxu1 %vm5702_vm2, %v5701_v2 }
0x10e3   :  { %5468 = vmatprep.subr.bf16.mxu1 %v5708_v43 }
0x11b4   :  { %v2513_v53 = vpop.f32.mrb[22].mxu1 }
0x11b5   :  { %v2514_v54 = vadd.f32 %v2513_v53, %v6291_v18  ;;  %v5308_v55 = vpop.f32.mrb[23].mxu1 }
0x11b6   :  { %v6439_v55 = vld [vmem:[%s6657_s18] sm:$0xff] }
0x11b7   :  { %v2517_v56 = vadd.f32 %v6279_v62, %v2514_v54  ;;  %v3388_v54 = vld [vmem:[%s6656_s16] sm:$0xff] }
0x11b9   :  { %v2518_v5 = vmax.f32 %v2517_v56, 0.0  ;;  %v3387_v56 = vld [vmem:[%s6658_s5] sm:$0xff] }
0x11bb   :  { %5317 = vmatmul.mubr.msk.f32.vlgmr.msra.gmra.mrb[24].mxu1 %vm211_vm1, %v2518_v5 }
0x11bc   :  { %5328 = vmatprep.mubr.msk.f32.mxu1 %vm5702_vm2, %v5701_v2 }
0x128e   :  { %v2660_v63 = vpop.f32.mrb[24].mxu1 }
0x128f   :  { %v2661_v3 = vadd.f32 %v2660_v63, %v6308_v21  ;;  %v5318_v8 = vpop.f32.mrb[25].mxu1 }
0x1291   :  { %v6349_v11 = vadd.f32 %v6287_v20, %v2661_v3 }
0x1293   :  { %5319 = vmatprep.subr.msk.mxu0 %vm1899_vm9, %v6349_v11 }
0x1294   :  { %5320 = vmatpush3.msk.msra.mxu0 %vm1899_vm9, %v6349_v11 }
0x1295   :  { %5322 = vmatmul.mubr.msk.f32.vlgmr.msra.gmra.mrb[26].mxu0 %vm1892_vm10, %v6203_v6  ;;  %5331 = vmatprep.subr.mxu0 %v5701_v2 }
0x1296   :  { %5332 = vmatpush3.msk.msra.mxu0 %vm215_vm0, %v6207_v61  ;;  %5333 = vmatprep.mubr.msk.f32.mxu0 %vm5702_vm2, %v5701_v2 }
0x1297   :  { %5341 = vmatprep.subr.mxu0 %v5701_v2 }
0x1299   :  { %5334 = vmatmul.mubr.msk.f32.vlgmr.msra.gmra.mrb[28].mxu0 %vm211_vm1, %v6349_v11 }
0x129a   :  { %5343 = vmatprep.mubr.msk.f32.mxu0 %vm5702_vm2, %v5701_v2 }
0x1368   :  { %v5323_v12 = vpop.f32.mrb[26].mxu0 }
0x1369   :  { %2760 = vperm.xlu1 %5573, %v5323_v12   ;;  %v2734_v22 = vpop.f32.mrb[27].mxu0 }
0x136a   :  { %2756 = vperm.xlu0 %5574, %v2734_v22  }
0x136c   :  { %v6367_v6 = vpop.f32.mrb[28].mxu0 }
0x136d   :  { %5576 = vset.pattern.permute.xlu1 %v5703_v9  ;;  %v5335_v61 = vpop.f32.mrb[29].mxu0 }
0x136e   :  { %2776 = vperm.xlu1 %5576, %v2734_v22   ;;  %5575 = vset.pattern.permute.xlu0 %v5703_v9 }
0x136f   :  { %2780 = vperm.xlu0 %5575, %v5323_v12  }
0x1372   :  { %5577 = vset.pattern.permute.xlu1 %v5705_v31 }
0x1373   :  { %2796 = vperm.xlu1 %5577, %v2734_v22   ;;  %5579 = vset.pattern.permute.xlu0 %v5706_v32 }
0x1374   :  { %2745 = vperm.xlu0 %5579, %v2734_v22  }
0x1377   :  { %2800 = vperm.xlu1 %5577, %v5323_v12  }
0x1378   :  { %5580 = vset.pattern.permute.xlu0 %v5705_v31 }
0x137b   :  { %5578 = vset.pattern.permute.xlu1 %v5706_v32 }
0x137c   :  { %2750 = vperm.xlu1 %5578, %v5323_v12  }
0x13e8   :  { %v2761_v14 = vpop.permute.xlu1 %2760 }
0x13e9   :  { %v2764_v16 = vmul.f32 %v2761_v14, %v6239_v27  ;;  %v2757_v18 = vpop.permute.xlu0 %2756 }
0x13ea   :  { %v2763_v58 = vmul.f32 %v2757_v18, %v6241_v29 }
0x13eb   :  { %2769 = vrot.lane.b32.xlu0 %v2764_v16, %s5707_s0 }
0x13ec   :  { %2767 = vrot.lane.b32.xlu1 %v2763_v58, %s5707_s0  ;;  %v6461_v58 = vld [vmem:[%s6659_s22] sm:$0x1]  ;;  %s5716_s0 = smov 104  }
0x13ed   :  { %v2777_v9 = vpop.permute.xlu1 %2776 }
0x13ee   :  { %v2783_v19 = vmul.f32 %v2777_v9, %v6241_v29  ;;  %v2781_v21 = vpop.permute.xlu0 %2780 }
0x13ef   :  { %v2784_v13 = vmul.f32 %v2781_v21, %v6239_v27 }
0x13f0   :  { %2787 = vrot.lane.b32.xlu1 %v2783_v19, %s5709_s9 }
0x13f1   :  { %2789 = vrot.lane.b32.xlu0 %v2784_v13, %s5709_s9  ;;  %s6661_s9 = sld [smem:[#allocation28_spill]] }
0x13f2   :  { %v2797_v31 = vpop.permute.xlu1 %2796 }
0x13f3   :  { %v2803_v32 = vmul.f32 %v2797_v31, %v6241_v29  ;;  %v2746_v25 = vpop.permute.xlu0 %2745 }
0x13f4   :  { %v2753_v30 = vmul.f32 %v2746_v25, %v6241_v29 }
0x13f5   :  { %2807 = vrot.lane.b32.xlu1 %v2803_v32, %s5710_s13 }
0x13f6   :  { %v2801_v60 = vpop.permute.xlu1 %2800 }
0x13f7   :  { %v2804_v17 = vmul.f32 %v2801_v60, %v6239_v27 }
0x13f9   :  { %2809 = vrot.lane.b32.xlu0 %v2804_v17, %s5710_s13  ;;  %s6662_s13 = sld [smem:[#allocation26_spill]] }
0x13fb   :  { %v2751_v23 = vpop.permute.xlu1 %2750 }
0x13fc   :  { %v2754_v33 = vmul.f32 %v2751_v23, %v6239_v27 }
0x145d   :  { %v2770_v7 = vpop.permute.xlu0 %2769 }
0x145e   :  { %v2768_v24 = vpop.permute.xlu1 %2767  ;;  %v2774_v35 = vadd.f32 %v2770_v7, %v2754_v33 }
0x145f   :  { %v2773_v36 = vadd.f32 %v2768_v24, %v2753_v30  ;;  %v3630_v30 = vlaneseq }
0x1461   :  { %v3631_v33 = vshrl.u32 %v3630_v30, 7  ;;  %v6518_v30 = vld [vmem:[%s6663_s17] sm:$0x1] }
0x1462   :  { %v2788_v28 = vpop.permute.xlu1 %2787 }
0x1463   :  { %v2790_v10 = vpop.permute.xlu0 %2789  ;;  %v2793_v39 = vadd.f32 %v2788_v28, %v2773_v36 }
0x1464   :  { %v2794_v40 = vadd.f32 %v2790_v10, %v2774_v35  ;;  %v6471_v10 = vsub.s32 0, %v3631_v33 }
0x1467   :  { %v2808_v37 = vpop.permute.xlu1 %2807 }
0x1468   :  { %v2813_v42 = vadd.f32 %v2808_v37, %v2793_v39 }
0x146b   :  { %v2810_v41 = vpop.permute.xlu0 %2809 }
0x146c   :  { %v2814_v44 = vadd.f32 %v2810_v41, %v2794_v40 }
0x146e   :  { %v5469_v45 = vpack.c.bf16 %v2814_v44, %v2813_v42 }
0x1470   :  { %5471 = vmatpush3.bf16.msk.msra.mxu1 %vm6258_vm12, %v5469_v45 }
0x1471   :  { %5336 = vmatprep.subr.mxu1 %v5701_v2 }
0x1473   :  { %5329 = vmatmul.mubr.msk.f32.vlgmr.msra.gmra.mrb[26].mxu1 %vm2050_vm13, %v6265_v57  ;;  %v3038_v57 = vld [vmem:[%s6654_s11] sm:$0x1] }
0x1474   :  { %5337 = vmatpush3.msk.msra.mxu1 %vm215_vm0, %v6273_v59  ;;  %5338 = vmatprep.mubr.msk.f32.mxu1 %vm5702_vm2, %v5701_v2  ;;  %v3037_v59 = vld [vmem:[%s6655_s15] sm:$0x3f]  ;;  %vm3639_vm0 = vcmask 62464  }
0x1475   :  { %5346 = vmatprep.subr.mxu1 %v5701_v2  ;;  %5342 = vmatpush3.msk.msra.mxu0 %vm3043_vm14, %v3038_v57 }
0x1476   :  { %5351 = vmatprep.subr.mxu0 %v5701_v2  ;;  %5344 = vmatmul.mubr.msk.f32.vlgmr.msra.gmra.mrb[30].mxu0 %vm3039_vm15, %v3037_v59 }
0x1477   :  { %5353 = vmatprep.mubr.msk.f32.mxu0 %vm5702_vm2, %v5701_v2 }
0x1546   :  { %v2884_v27 = vpop.f32.mrb[26].mxu1 }
0x1547   :  { %v2885_v29 = vadd.f32 %v2884_v27, %v6349_v11  ;;  %v5330_v46 = vpop.f32.mrb[27].mxu1  ;;  %v3954_v27 = vld [vmem:[%s6660_s2] sm:$0xff] }
0x1548   :  { %v3953_v46 = vld [vmem:[%s6662_s13] sm:$0xff] }
0x1549   :  { %v2888_v4 = vadd.f32 %v6279_v62, %v2885_v29  ;;  %v3113_v15 = vpop.f32.mrb[30].mxu0  ;;  %v6491_v29 = vld [vmem:[%s6661_s9] sm:$0xff] }
0x154b   :  { %v2889_v47 = vmax.f32 %v2888_v4, 0.0 }
0x154d   :  { %5339 = vmatmul.mubr.msk.f32.vlgmr.msra.gmra.mrb[28].mxu1 %vm211_vm1, %v2889_v47 }
0x154e   :  { %5348 = vmatprep.mubr.msk.f32.mxu1 %vm5702_vm2, %v5701_v2 }
0x1620   :  { %v3031_v48 = vpop.f32.mrb[28].mxu1 }
0x1621   :  { %v3032_v62 = vadd.f32 %v3031_v48, %v6367_v6  ;;  %v5340_v49 = vpop.f32.mrb[29].mxu1 }
0x1623   :  { %v3035_v50 = vadd.f32 %v6287_v20, %v3032_v62 }
0x1625   :  { %v6414_v34 = vadd.f32 %v3035_v50, %v6159_v26  ;;  %v5345_v26 = vpop.f32.mrb[31].mxu0 }
0x1627   :  { %5347 = vmatpush3.xpose.msk.msra.mxu1 %vm211_vm1, %v6414_v34  ;;  %5352 = vmatpush3.msk.msra.mxu0 %vm1899_vm9, %v6414_v34 }
0x1628   :  { %5356 = vmatprep.subr.mxu1 %v5701_v2  ;;  %5361 = vmatprep.subr.mxu0 %v5701_v2 }
0x162a   :  { %5349 = vmatmul.mubr.msk.f32.vlgmr.msra.gmra.mrb[30].mxu1 %vm211_vm1, %v6421_v52 }
0x162b   :  { %5357 = vmatpush3.msk.msra.mxu1 %vm303_vm3, %v6421_v52  ;;  %5358 = vmatprep.mubr.msk.f32.mxu1 %vm5702_vm2, %v5701_v2 }
0x162c   :  { %5366 = vmatprep.subr.mxu1 %v5701_v2 }
0x16fd   :  { %v3189_v0 = vpop.f32.mrb[30].mxu1 }
0x16fe   :  { %5581 = vtanh.f32 %v3189_v0  ;;  %v5350_v20 = vpop.f32.mrb[31].mxu1 }
0x1708   :  { %v5582_v1 = vpop.eup %5581 }
0x1709   :  { %v3194_v53 = vmul.f32 %v5582_v1, %v3113_v15 }
0x170b   :  { %3270 = vxpose.xlu1.b32.start.end [1/1] (short) (narrow) %v3194_v53, 8  ;;  %5354 = vmatmul.mubr.msk.f32.vlgmr.msra.gmra.mrb[32].mxu0 %vm1892_vm10, %v3194_v53 }
0x170c   :  { %5362 = vmatpush3.msra.mxu0 %v3388_v54  ;;  %5363 = vmatprep.mubr.msk.f32.mxu0 %vm5702_vm2, %v5701_v2 }
0x170d   :  { %5371 = vmatprep.subr.mxu0 %v5701_v2 }
0x170f   :  { %5364 = vmatmul.mubr.f32.vlgmr.msra.gmra.mrb[34].mxu0 %v5701_v2 }
0x1710   :  { %5372 = vmatpush3.msra.mxu0 %v6439_v55  ;;  %5373 = vmatprep.mubr.msk.f32.mxu0 %vm5702_vm2, %v5701_v2 }
0x1711   :  { %5381 = vmatprep.subr.mxu0 %v5701_v2 }
0x1713   :  { %5374 = vmatmul.mubr.f32.vlgmr.msra.gmra.mrb[36].mxu0 %v5701_v2 }
0x1714   :  { %5382 = vmatpush3.msra.mxu0 %v3387_v56  ;;  %5383 = vmatprep.mubr.msk.f32.mxu0 %vm5702_vm2, %v5701_v2 }
0x1715   :  { %5391 = vmatprep.subr.mxu0 %v5701_v2 }
0x178b   :  { %v3286_v5 = vpop.trf.xlu1 }
0x178c   :  { %5359 = vmatmul.mubr.msk.f32.vlgmr.msra.gmra.mrb[32].mxu1 %vm296_vm4, %v3286_v5  ;;  %vm4202_vm4 = vcmask 61440  }
0x178d   :  { %5367 = vmatpush3.msra.mxu1 %v3387_v56  ;;  %5368 = vmatprep.mubr.msk.f32.mxu1 %vm5702_vm2, %v5701_v2 }
0x178e   :  { %5376 = vmatprep.subr.mxu1 %v5701_v2 }
0x1790   :  { %5369 = vmatmul.mubr.f32.vlgmr.msra.gmra.mrb[34].mxu1 %v5701_v2 }
0x1791   :  { %5377 = vmatpush3.msra.mxu1 %v3388_v54  ;;  %5378 = vmatprep.mubr.msk.f32.mxu1 %vm5702_vm2, %v5701_v2 }
0x1792   :  { %5386 = vmatprep.subr.mxu1 %v5701_v2 }
0x17de   :  { %v3266_v63 = vpop.f32.mrb[32].mxu0 }
0x17df   :  { %v5355_v3 = vpop.f32.mrb[33].mxu0 }
0x17e2   :  { %v3460_v8 = vpop.f32.mrb[34].mxu0 }
0x17e3   :  { %v5365_v11 = vpop.f32.mrb[35].mxu0 }
0x17e6   :  { %v3600_v12 = vpop.f32.mrb[36].mxu0 }
0x17e7   :  { %v5375_v22 = vpop.f32.mrb[37].mxu0 }
0x185f   :  { %v6458_v6 = vpop.f32.mrb[32].mxu1 }
0x1860   :  { %v5360_v61 = vpop.f32.mrb[33].mxu1 }
0x1863   :  { %v3530_v14 = vpop.f32.mrb[34].mxu1 }
0x1864   :  { %v3531_v16 = vadd.f32 %v3530_v14, %v3460_v8  ;;  %v5370_v18 = vpop.f32.mrb[35].mxu1 }
0x1866   :  { %v3604_v9 = vadd.f32 %v3600_v12, %v3531_v16 }
0x1868   :  { %v3605_v19 = vadd.f32 %v3604_v9, %v6461_v58 }
0x186a   :  { %5583 = vtanh.f32 %v3605_v19  ;;  %v5045_v13 = vmul.f32 -1.442695, %v3605_v19 }
0x186c   :  { %5585 = vpow2.f32 %v5045_v13 }
0x1874   :  { %v5584_v21 = vpop.eup %5583 }
0x1875   :  { %3615 = vrot.lane.b32.xlu0 %v5584_v21, %s5712_s23 }
0x1876   :  { %v5586_v31 = vpop.eup %5585 }
0x1877   :  { %v3609_v32 = vadd.f32 1.0, %v5586_v31 }
0x1879   :  { %5587 = vrcp.f32 %v3609_v32 }
0x1883   :  { %v5588_v60 = vpop.eup %5587 }
0x1884   :  { %v3613_v24 = vmul.f32 0.0, %v5588_v60 }
0x18e7   :  { %v3616_v17 = vpop.permute.xlu0 %3615 }
0x18e8   :  { %v3618_v23 = vmul.f32 %v5588_v60, %v3616_v17 }
0x18ea   :  { %3620 = vrot.lane.b32.xlu0 %v3618_v23, %s5713_s26 }
0x195c   :  { %v3621_v25 = vpop.permute.xlu0 %3620 }
0x195d   :  { %v6466_v7 = vadd.f32 %v3621_v25, %v3613_v24 }
0x195f   :  { %5589 = vtanh.f32 %v6466_v7 }
0x1969   :  { %v5590_v28 = vpop.eup %5589 }
0x196a   :  { %3626 = vrot.lane.b32.xlu0 %v5590_v28, %s5714_s1 }
0x196e   :  { %3378 = vrot.lane.b32.xlu0 %v3266_v63, %s5715_s28 }
0x19dc   :  { %v3627_v35 = vpop.permute.xlu0 %3626 }
0x19dd   :  { %v3629_v36 = vmul.f32 %v5588_v60, %v3627_v35 }
0x19df   :  { %v3633_v37 = vrot.slane %v3629_v36, %v6471_v10  ;;  %3744 = vrot.lane.b32.xlu1 %v3629_v36, %s5716_s0 }
0x19e0   :  { %v3379_v39 = vpop.permute.xlu0 %3378 }
0x19e1   :  { %3635 = vrot.lane.b32.xlu0 %v3633_v37, %s5716_s0  ;;  %v6479_v41 = vsel %vm211_vm1, %v6421_v52, %v3379_v39 }
0x1a51   :  { %v3745_v40 = vpop.permute.xlu1 %3744 }
0x1a52   :  { %5384 = vmatmul.mubr.msk.f32.vlgmr.msra.gmra.mrb[38].mxu0 %vm390_vm5, %v3745_v40 }
0x1a53   :  { %v3636_v42 = vpop.permute.xlu0 %3635  ;;  %5393 = vmatprep.mubr.msk.f32.mxu0 %vm5702_vm2, %v5701_v2  ;;  %5392 = vmatpush3.msra.mxu0 %v3954_v27 }
0x1a54   :  { %v3638_v44 = vmul.f32 %v3636_v42, %v6479_v41  ;;  %5401 = vmatprep.subr.mxu0 %v5701_v2 }
0x1a56   :  { %v3640_v45 = vsel %vm3639_vm0, %v3638_v44, 0.0  ;;  %5394 = vmatmul.mubr.f32.vlgmr.msra.gmra.mrb[40].mxu0 %v5701_v2 }
0x1a57   :  { %3641 = vadd.xlane.f32.xlu0 %v3640_v45  ;;  %5403 = vmatprep.mubr.msk.f32.mxu0 %vm5702_vm2, %v5701_v2 }
0x1a58   :  { %5402 = vmatpush3.msra.mxu0 %v6491_v29 }
0x1a59   :  { %5411 = vmatprep.subr.mxu0 %v5701_v2 }
0x1a5a   :  { %5404 = vmatmul.mubr.f32.vlgmr.msra.gmra.mrb[42].mxu0 %v5701_v2 }
0x1a5b   :  { %5412 = vmatpush3.msra.mxu0 %v3953_v46  ;;  %5413 = vmatprep.mubr.msk.f32.mxu0 %vm5702_vm2, %v5701_v2 }
0x1a5c   :  { %5421 = vmatprep.subr.mxu0 %v5701_v2 }
0x1ae4   :  { %v3642_v4 = vpop.xlane.xlu0 %3641 }
0x1ae5   :  { %v3643_v47 = vsel %vm303_vm3, %v3642_v4, -inf }
0x1ae6   :  { %v3644_v57 = vrot.slane %v3643_v47, 4 }
0x1ae8   :  { %v3645_v59 = vmax.f32 %v3643_v47, %v3644_v57 }
0x1aea   :  { %v3646_v48 = vrot.slane %v3645_v59, 2 }
0x1aec   :  { %v3647_v62 = vmax.f32 %v3645_v59, %v3646_v48 }
0x1aee   :  { %v3648_v49 = vrot.slane %v3647_v62, 1 }
0x1af0   :  { %v3649_v50 = vmax.f32 %v3647_v62, %v3648_v49 }
0x1af2   :  { %v3650_v51 = vsub.f32 %v3642_v4, %v3649_v50 }
0x1af4   :  { %v3651_v38 = vmul.f32 1.442695, %v3650_v51 }
0x1af6   :  { %5591 = vpow2.f32 %v3651_v38 }
0x1b00   :  { %v5592_v52 = vpop.eup %5591 }
0x1b01   :  { %v3653_v15 = vsel %vm303_vm3, %v5592_v52, 0.0 }
0x1b02   :  { %v3654_v26 = vrot.slane %v3653_v15, 4 }
0x1b04   :  { %v3655_v0 = vadd.f32 %v3654_v26, %v3653_v15 }
0x1b06   :  { %v3656_v20 = vrot.slane %v3655_v0, 2 }
0x1b08   :  { %v3657_v1 = vadd.f32 %v3656_v20, %v3655_v0 }
0x1b0a   :  { %v3658_v53 = vrot.slane %v3657_v1, 1 }
0x1b0c   :  { %v3659_v54 = vadd.f32 %v3658_v53, %v3657_v1 }
0x1b0e   :  { %5593 = vrcp.f32 %v3659_v54 }
0x1b18   :  { %v5594_v56 = vpop.eup %5593 }
0x1b19   :  { %v3661_v5 = vmul.f32 %v5594_v56, %v5592_v52 }
0x1b1b   :  { %v3662_v63 = vmul.f32 %v3661_v5, %v6479_v41 }
0x1b1d   :  { %v3663_v3 = vsel %vm3639_vm0, %v3662_v63, 0.0 }
0x1b1e   :  { %v3664_v8 = vrot.slane %v3663_v3, 4 }
0x1b20   :  { %v3665_v11 = vadd.f32 %v3664_v8, %v3663_v3 }
0x1b22   :  { %v3666_v12 = vrot.slane %v3665_v11, 2 }
0x1b24   :  { %v3667_v22 = vadd.f32 %v3666_v12, %v3665_v11 }
0x1b25   :  { %v3814_v61 = vpop.f32.mrb[38].mxu0 }
0x1b26   :  { %v5385_v14 = vpop.f32.mrb[39].mxu0  ;;  %v3668_v16 = vrot.slane %v3667_v22, 1 }
0x1b28   :  { %v3669_v18 = vadd.f32 %v3668_v16, %v3667_v22 }
0x1b2a   :  { %5379 = vmatmul.mubr.msk.f32.vlgmr.msra.gmra.mrb[36].mxu1 %vm390_vm5, %v3669_v18 }
0x1b2b   :  { %5387 = vmatpush3.msra.mxu1 %v6439_v55  ;;  %5388 = vmatprep.mubr.msk.f32.mxu1 %vm5702_vm2, %v5701_v2  ;;  %v4023_v55 = vpop.f32.mrb[40].mxu0 }
0x1b2c   :  { %5396 = vmatprep.subr.mxu1 %v5701_v2  ;;  %v5395_v9 = vpop.f32.mrb[41].mxu0 }
0x1b2d   :  { %v4163_v19 = vpop.f32.mrb[42].mxu0 }
0x1b2e   :  { %5389 = vmatmul.mubr.msk.f32.vlgmr.msra.gmra.mrb[38].mxu1 %vm390_vm5, %v3745_v40  ;;  %v5405_v21 = vpop.f32.mrb[43].mxu0 }
0x1b2f   :  { %5397 = vmatpush3.msra.mxu1 %v3953_v46  ;;  %5398 = vmatprep.mubr.msk.f32.mxu1 %vm5702_vm2, %v5701_v2 }
0x1b30   :  { %5406 = vmatprep.subr.mxu1 %v5701_v2 }
0x1b32   :  { %5399 = vmatmul.mubr.f32.vlgmr.msra.gmra.mrb[40].mxu1 %v5701_v2 }
0x1b33   :  { %5407 = vmatpush3.msra.mxu1 %v3954_v27  ;;  %5408 = vmatprep.mubr.msk.f32.mxu1 %vm5702_vm2, %v5701_v2 }
0x1b34   :  { %5416 = vmatprep.subr.mxu1 %v5701_v2 }
0x1bfd   :  { %v3739_v13 = vpop.f32.mrb[36].mxu1 }
0x1bfe   :  { %v3815_v31 = vadd.f32 %v3814_v61, %v3739_v13  ;;  %v5380_v32 = vpop.f32.mrb[37].mxu1 }
0x1c01   :  { %v3884_v60 = vpop.f32.mrb[38].mxu1 }
0x1c02   :  { %v3888_v17 = vadd.f32 %v3884_v60, %v3815_v31  ;;  %v5390_v23 = vpop.f32.mrb[39].mxu1 }
0x1c05   :  { %v4093_v24 = vpop.f32.mrb[40].mxu1 }
0x1c06   :  { %v4094_v25 = vadd.f32 %v4093_v24, %v4023_v55  ;;  %v5400_v28 = vpop.f32.mrb[41].mxu1 }
0x1c08   :  { %v4167_v33 = vadd.f32 %v4163_v19, %v4094_v25 }
0x1c0a   :  { %v4168_v35 = vadd.f32 %v4167_v33, %v6518_v30 }
0x1c0c   :  { %5595 = vtanh.f32 %v4168_v35  ;;  %v5050_v37 = vmul.f32 -1.442695, %v4168_v35 }
0x1c0e   :  { %5597 = vpow2.f32 %v5050_v37 }
0x1c16   :  { %v5596_v36 = vpop.eup %5595 }
0x1c17   :  { %4178 = vrot.lane.b32.xlu0 %v5596_v36, %s5712_s23 }
0x1c18   :  { %v5598_v39 = vpop.eup %5597 }
0x1c19   :  { %v4172_v40 = vadd.f32 1.0, %v5598_v39 }
0x1c1b   :  { %3383 = vrot.lane.b32.xlu0 %v6458_v6, %s5715_s28  ;;  %5599 = vrcp.f32 %v4172_v40  ;;  %v3889_v6 = vadd.f32 %v3888_v17, %v6461_v58 }
0x1c1d   :  { %v5049_v24 = vmul.f32 -1.442695, %v3889_v6 }
0x1c25   :  { %v5600_v42 = vpop.eup %5599 }
0x1c26   :  { %v4176_v27 = vmul.f32 0.0, %v5600_v42 }
0x1c89   :  { %v4179_v44 = vpop.permute.xlu0 %4178 }
0x1c8a   :  { %v4181_v45 = vmul.f32 %v5600_v42, %v4179_v44 }
0x1c8c   :  { %4183 = vrot.lane.b32.xlu1 %v4181_v45, %s5713_s26 }
0x1c8d   :  { %v3384_v49 = vpop.permute.xlu0 %3383 }
0x1c8e   :  { %v6536_v50 = vsel %vm211_vm1, %v6414_v34, %v3384_v49  ;;  %vm4824_vm1 = vcmask 130048  }
0x1cfe   :  { %v4184_v46 = vpop.permute.xlu1 %4183 }
0x1cff   :  { %v6525_v4 = vadd.f32 %v4184_v46, %v4176_v27 }
0x1d01   :  { %5601 = vtanh.f32 %v6525_v4 }
0x1d02   :  { %5603 = vtanh.f32 %v3889_v6 }
0x1d0b   :  { %v5602_v47 = vpop.eup %5601 }
0x1d0c   :  { %4189 = vrot.lane.b32.xlu1 %v5602_v47, %s5714_s1  ;;  %v5604_v62 = vpop.eup %5603 }
0x1d7e   :  { %v4190_v57 = vpop.permute.xlu1 %4189 }
0x1d7f   :  { %v4192_v59 = vmul.f32 %v5600_v42, %v4190_v57 }
0x1d81   :  { %v4196_v48 = vrot.slane %v4192_v59, %v6471_v10 }
0x1d83   :  { %4198 = vrot.lane.b32.xlu1 %v4196_v48, %s5716_s0 }
0x1d87   :  { %4307 = vrot.lane.b32.xlu1 %v4192_v59, %s5716_s0 }
0x1d8b   :  { %3899 = vrot.lane.b32.xlu1 %v5604_v62, %s5712_s23 }
0x1df5   :  { %v4199_v51 = vpop.permute.xlu1 %4198 }
0x1df6   :  { %v4201_v58 = vmul.f32 %v4199_v51, %v6536_v50 }
0x1df8   :  { %v4203_v38 = vsel %vm4202_vm4, %v4201_v58, 0.0 }
0x1df9   :  { %4204 = vadd.xlane.f32.xlu0 %v4203_v38  ;;  %v4308_v52 = vpop.permute.xlu1 %4307 }
0x1dfa   :  { %5414 = vmatmul.mubr.msk.f32.vlgmr.msra.gmra.mrb[44].mxu0 %vm390_vm5, %v4308_v52 }
0x1dfb   :  { %5423 = vmatprep.mubr.msk.f32.mxu0 %vm5702_vm2, %v5701_v2 }
0x1dfd   :  { %v3900_v44 = vpop.permute.xlu1 %3899 }
0x1e86   :  { %v4205_v15 = vpop.xlane.xlu0 %4204 }
0x1e87   :  { %v4206_v26 = vsel %vm1899_vm9, %v4205_v15, -inf }
0x1e88   :  { %v4207_v0 = vrot.slane %v4206_v26, 4 }
0x1e8a   :  { %v4208_v20 = vmax.f32 %v4206_v26, %v4207_v0 }
0x1e8c   :  { %v4209_v34 = vrot.slane %v4208_v20, 2 }
0x1e8e   :  { %v4210_v1 = vmax.f32 %v4208_v20, %v4209_v34 }
0x1e90   :  { %v4211_v53 = vrot.slane %v4210_v1, 1 }
0x1e92   :  { %v4212_v54 = vmax.f32 %v4210_v1, %v4211_v53 }
0x1e94   :  { %v4213_v56 = vsub.f32 %v4205_v15, %v4212_v54 }
0x1e96   :  { %v4214_v5 = vmul.f32 1.442695, %v4213_v56  ;;  %v4516_v56 = vld [vmem:[%s6664_s3] sm:$0xff] }
0x1e98   :  { %5605 = vpow2.f32 %v4214_v5  ;;  %v4517_v5 = vld [vmem:[%s6665_s8] sm:$0xff] }
0x1e99   :  { %5422 = vmatpush3.msra.mxu0 %v4517_v5 }
0x1e9a   :  { %5431 = vmatprep.subr.mxu0 %v5701_v2 }
0x1ea2   :  { %v5606_v63 = vpop.eup %5605 }
0x1ea3   :  { %v4216_v3 = vsel %vm1899_vm9, %v5606_v63, 0.0 }
0x1ea4   :  { %v4217_v8 = vrot.slane %v4216_v3, 4 }
0x1ea6   :  { %v4218_v11 = vadd.f32 %v4217_v8, %v4216_v3 }
0x1ea8   :  { %v4219_v12 = vrot.slane %v4218_v11, 2 }
0x1eaa   :  { %v4220_v22 = vadd.f32 %v4219_v12, %v4218_v11 }
0x1eac   :  { %v4221_v61 = vrot.slane %v4220_v22, 1 }
0x1eae   :  { %v4222_v14 = vadd.f32 %v4221_v61, %v4220_v22 }
0x1eb0   :  { %5607 = vrcp.f32 %v4222_v14 }
0x1eb1   :  { %5609 = vpow2.f32 %v5049_v24 }
0x1eba   :  { %v5608_v16 = vpop.eup %5607 }
0x1ebb   :  { %v4224_v18 = vmul.f32 %v5608_v16, %v5606_v63  ;;  %v5610_v35 = vpop.eup %5609 }
0x1ebc   :  { %v3893_v39 = vadd.f32 1.0, %v5610_v35 }
0x1ebd   :  { %v4225_v55 = vmul.f32 %v4224_v18, %v6536_v50 }
0x1ebf   :  { %v4226_v9 = vsel %vm4202_vm4, %v4225_v55, 0.0 }
0x1ec0   :  { %v4227_v19 = vrot.slane %v4226_v9, 4 }
0x1ec2   :  { %v4228_v21 = vadd.f32 %v4227_v19, %v4226_v9 }
0x1ec4   :  { %v4229_v13 = vrot.slane %v4228_v21, 2 }
0x1ec6   :  { %v4230_v31 = vadd.f32 %v4229_v13, %v4228_v21 }
0x1ec8   :  { %v4231_v32 = vrot.slane %v4230_v31, 1 }
0x1eca   :  { %v4232_v60 = vadd.f32 %v4231_v32, %v4230_v31 }
0x1ecc   :  { %5409 = vmatmul.mubr.msk.f32.vlgmr.msra.gmra.mrb[42].mxu1 %vm390_vm5, %v4232_v60 }
0x1ecd   :  { %v4377_v17 = vpop.f32.mrb[44].mxu0  ;;  %5417 = vmatpush3.msra.mxu1 %v6491_v29  ;;  %5418 = vmatprep.mubr.msk.f32.mxu1 %vm5702_vm2, %v5701_v2 }
0x1ece   :  { %v5415_v23 = vpop.f32.mrb[45].mxu0  ;;  %5426 = vmatprep.subr.mxu1 %v5701_v2 }
0x1ed0   :  { %5419 = vmatmul.mubr.msk.f32.vlgmr.msra.gmra.mrb[44].mxu1 %vm390_vm5, %v4308_v52 }
0x1ed1   :  { %5428 = vmatprep.mubr.msk.f32.mxu1 %vm5702_vm2, %v5701_v2  ;;  %5427 = vmatpush3.msra.mxu1 %v4516_v56 }
0x1ed2   :  { %5436 = vmatprep.subr.mxu1 %v5701_v2 }
0x1f9f   :  { %v4302_v25 = vpop.f32.mrb[42].mxu1 }
0x1fa0   :  { %v4378_v28 = vadd.f32 %v4377_v17, %v4302_v25  ;;  %v5410_v33 = vpop.f32.mrb[43].mxu1  ;;  %v4743_v25 = vld [vmem:[%s6666_s14] sm:$0xff] }
0x1fa3   :  { %v4447_v36 = vpop.f32.mrb[44].mxu1 }
0x1fa4   :  { %v4451_v37 = vadd.f32 %v4447_v36, %v4378_v28  ;;  %v5420_v29 = vpop.f32.mrb[45].mxu1 }
0x1fa6   :  { %v4452_v40 = vadd.f32 %v4451_v37, %v6518_v30 }
0x1fa8   :  { %5611 = vtanh.f32 %v4452_v40  ;;  %v5054_v46 = vmul.f32 -1.442695, %v4452_v40 }
0x1fa9   :  { %5613 = vrcp.f32 %v3893_v39 }
0x1faa   :  { %5615 = vpow2.f32 %v5054_v46 }
0x1fb2   :  { %v5612_v42 = vpop.eup %5611 }
0x1fb3   :  { %4462 = vrot.lane.b32.xlu1 %v5612_v42, %s5712_s23  ;;  %v5614_v45 = vpop.eup %5613 }
0x1fb4   :  { %v3902_v27 = vmul.f32 %v5614_v45, %v3900_v44  ;;  %v5616_v47 = vpop.eup %5615  ;;  %v3897_v30 = vmul.f32 %v5614_v45, %v6466_v7 }
0x1fb5   :  { %v4456_v6 = vadd.f32 1.0, %v5616_v47 }
0x1fb7   :  { %3904 = vrot.lane.b32.xlu1 %v3902_v27, %s5713_s26  ;;  %5617 = vrcp.f32 %v4456_v6 }
0x1fc1   :  { %v5618_v57 = vpop.eup %5617 }
0x1fc2   :  { %v4460_v58 = vmul.f32 %v5618_v57, %v6525_v4 }
0x2025   :  { %v4463_v59 = vpop.permute.xlu1 %4462 }
0x2026   :  { %v4465_v48 = vmul.f32 %v5618_v57, %v4463_v59 }
0x2028   :  { %4467 = vrot.lane.b32.xlu1 %v4465_v48, %s5713_s26 }
0x2029   :  { %v3905_v62 = vpop.permute.xlu1 %3904 }
0x202a   :  { %v3907_v49 = vadd.f32 %v3905_v62, %v3897_v30 }
0x202c   :  { %5619 = vtanh.f32 %v3907_v49 }
0x2036   :  { %v5620_v51 = vpop.eup %5619 }
0x2037   :  { %3910 = vrot.lane.b32.xlu1 %v5620_v51, %s5714_s1 }
0x209a   :  { %v4468_v38 = vpop.permute.xlu1 %4467 }
0x209b   :  { %v4470_v52 = vadd.f32 %v4468_v38, %v4460_v58 }
0x209d   :  { %5621 = vtanh.f32 %v4470_v52 }
0x20a7   :  { %v5622_v15 = vpop.eup %5621 }
0x20a8   :  { %4473 = vrot.lane.b32.xlu1 %v5622_v15, %s5714_s1 }
0x20a9   :  { %v3911_v26 = vpop.permute.xlu1 %3910 }
0x20aa   :  { %v3913_v0 = vmul.f32 %v5614_v45, %v3911_v26  ;;  %v4666_v45 = vld [vmem:[%s6667_s19] sm:$0xff] }
0x20ac   :  { %v3917_v7 = vrot.slane %v3913_v0, %v6471_v10 }
0x20ae   :  { %3919 = vrot.lane.b32.xlu1 %v3917_v7, %s5716_s0 }
0x211a   :  { %v4474_v20 = vpop.permute.xlu1 %4473 }
0x211b   :  { %v4476_v34 = vmul.f32 %v5618_v57, %v4474_v20 }
0x211d   :  { %v4480_v1 = vrot.slane %v4476_v34, %v6471_v10 }
0x211f   :  { %4482 = vrot.lane.b32.xlu0 %v4480_v1, %s5716_s0 }
0x2120   :  { %v3920_v4 = vpop.permute.xlu1 %3919 }
0x2121   :  { %v3922_v53 = vmul.f32 %v3920_v4, %v6479_v41 }
0x2123   :  { %v3923_v54 = vsel %vm3639_vm0, %v3922_v53, 0.0 }
0x2124   :  { %3924 = vadd.xlane.f32.xlu1 %v3923_v54 }
0x2135   :  { %4592 = vrot.lane.b32.xlu1 %v3913_v0, %s5716_s0 }
0x2191   :  { %v4483_v63 = vpop.permute.xlu0 %4482 }
0x2192   :  { %v4485_v10 = vmul.f32 %v4483_v63, %v6536_v50 }
0x2194   :  { %v4486_v3 = vsel %vm4202_vm4, %v4485_v10, 0.0 }
0x2195   :  { %4487 = vadd.xlane.f32.xlu0 %v4486_v3  ;;  %v4821_v3 = vld [vmem:[%s5941_s21] sm:$0xff] }
0x21ab   :  { %4668 = vrot.lane.b32.xlu0 %v4476_v34, %s5716_s0 }
0x21b1   :  { %v3925_v8 = vpop.xlane.xlu1 %3924 }
0x21b2   :  { %v3926_v11 = vsel %vm303_vm3, %v3925_v8, -inf }
0x21b3   :  { %v3927_v12 = vrot.slane %v3926_v11, 4 }
0x21b5   :  { %v3928_v22 = vmax.f32 %v3926_v11, %v3927_v12  ;;  %v4593_v61 = vpop.permute.xlu1 %4592 }
0x21b6   :  { %5429 = vmatmul.mubr.msk.f32.vlgmr.msra.gmra.mrb[46].mxu1 %vm390_vm5, %v4593_v61 }
0x21b7   :  { %v3929_v14 = vrot.slane %v3928_v22, 2  ;;  %5438 = vmatprep.mubr.msk.f32.mxu1 %vm5702_vm2, %v5701_v2  ;;  %5437 = vmatpush3.msra.mxu1 %v4743_v25 }
0x21b9   :  { %v3930_v16 = vmax.f32 %v3928_v22, %v3929_v14 }
0x21bb   :  { %v3931_v18 = vrot.slane %v3930_v16, 1 }
0x21bd   :  { %v3932_v55 = vmax.f32 %v3930_v16, %v3931_v18 }
0x21bf   :  { %v3933_v9 = vsub.f32 %v3925_v8, %v3932_v55  ;;  %v4822_v8 = vld [vmem:[%s5941_s21 + $0x8] sm:$0xff]  ;;  %v4818_v55 = vld [vmem:[%s5936_s25] sm:$0x1]  ;;  %s5632_s21 = scalar_lea.vmem %s4907_s30, 16 }
0x21c0   :  { %v5473_v11 = vpack.c.bf16 %v4822_v8, %v4821_v3  ;;  %p5633_p0 = scmp.ne.s32.totalorder %s4907_s30, %s5632_s21  ;;  %p5638_p2 = scmp.lt.s32.totalorder %s5636_s6, %s5632_s21 }
0x21c1   :  { %v3934_v19 = vmul.f32 1.442695, %v3933_v9 }
0x21c2   :  { %p5639_p3 = por %p5638_p2, %p5637_p1 }
0x21c3   :  { %5623 = vpow2.f32 %v3934_v19 }
0x21c4   :  { %p5640_p4 = pnand %p5639_p3, %p5633_p0 }
0x21cd   :  { %v5624_v21 = vpop.eup %5623 }
0x21ce   :  { %v3936_v13 = vsel %vm303_vm3, %v5624_v21, 0.0 }
0x21cf   :  { %v3937_v31 = vrot.slane %v3936_v13, 4 }
0x21d1   :  { %v3938_v32 = vadd.f32 %v3937_v31, %v3936_v13  ;;  %v4823_v31 = vld [vmem:[#allocation2] sm:$0x1] }
0x21d3   :  { %v3939_v60 = vrot.slane %v3938_v32, 2 }
0x21d5   :  { %v3940_v17 = vadd.f32 %v3939_v60, %v3938_v32 }
0x21d7   :  { %v3941_v23 = vrot.slane %v3940_v17, 1 }
0x21d9   :  { %v3942_v24 = vadd.f32 %v3941_v23, %v3940_v17 }
0x21db   :  { %5625 = vrcp.f32 %v3942_v24 }
0x21e5   :  { %v5626_v28 = vpop.eup %5625 }
0x21e6   :  { %v3944_v33 = vmul.f32 %v5626_v28, %v5624_v21 }
0x21e8   :  { %v3945_v35 = vmul.f32 %v3944_v33, %v6479_v41 }
0x21ea   :  { %v3946_v36 = vsel %vm3639_vm0, %v3945_v35, 0.0 }
0x21eb   :  { %v3947_v37 = vrot.slane %v3946_v36, 4 }
0x21ed   :  { %v3948_v29 = vadd.f32 %v3947_v37, %v3946_v36 }
0x21ef   :  { %v3949_v39 = vrot.slane %v3948_v29, 2 }
0x21f1   :  { %v3950_v40 = vadd.f32 %v3949_v39, %v3948_v29 }
0x21f3   :  { %v3951_v42 = vrot.slane %v3950_v40, 1 }
0x21f5   :  { %v3952_v44 = vadd.f32 %v3951_v42, %v3950_v40 }
0x21f7   :  { %5424 = vmatmul.mubr.msk.f32.vlgmr.msra.gmra.mrb[46].mxu0 %vm390_vm5, %v3952_v44 }
0x21f8   :  { %5432 = vmatpush3.msra.mxu0 %v4666_v45  ;;  %5433 = vmatprep.mubr.msk.f32.mxu0 %vm5702_vm2, %v5701_v2 }
0x21f9   :  { %5472 = vmatprep.subr.bf16.mxu0 %v5708_v43 }
0x2222   :  { %v4488_v27 = vpop.xlane.xlu0 %4487 }
0x2223   :  { %v4489_v41 = vsel %vm1899_vm9, %v4488_v27, -inf }
0x2224   :  { %v4490_v46 = vrot.slane %v4489_v41, 4 }
0x2226   :  { %v4491_v47 = vmax.f32 %v4489_v41, %v4490_v46  ;;  %v4669_v6 = vpop.permute.xlu0 %4668 }
0x2227   :  { %5434 = vmatmul.mubr.msk.f32.vlgmr.msra.gmra.mrb[48].mxu0 %vm390_vm5, %v4669_v6 }
0x2228   :  { %v4492_v57 = vrot.slane %v4491_v47, 2  ;;  %5445 = vmatprep.mubr.msk.f32.mxu0 %vm5702_vm2, %v5701_v2  ;;  %5474 = vmatpush3.bf16.msra.mxu0 %v5473_v11  ;;  %vm4898_vm2 = vcmask 0  }
0x222a   :  { %v4493_v59 = vmax.f32 %v4491_v47, %v4492_v57 }
0x222c   :  { %v4494_v48 = vrot.slane %v4493_v59, 1 }
0x222e   :  { %v4495_v30 = vmax.f32 %v4493_v59, %v4494_v48 }
0x2230   :  { %v4496_v62 = vsub.f32 %v4488_v27, %v4495_v30 }
0x2232   :  { %v4497_v49 = vmul.f32 1.442695, %v4496_v62 }
0x2234   :  { %5627 = vpow2.f32 %v4497_v49 }
0x223e   :  { %v5628_v51 = vpop.eup %5627 }
0x223f   :  { %v4499_v43 = vsel %vm1899_vm9, %v5628_v51, 0.0 }
0x2240   :  { %v4500_v58 = vrot.slane %v4499_v43, 4 }
0x2242   :  { %v4501_v38 = vadd.f32 %v4500_v58, %v4499_v43 }
0x2244   :  { %v4502_v52 = vrot.slane %v4501_v38, 2 }
0x2246   :  { %v4503_v15 = vadd.f32 %v4502_v52, %v4501_v38 }
0x2248   :  { %v4504_v26 = vrot.slane %v4503_v15, 1 }
0x224a   :  { %v4505_v0 = vadd.f32 %v4504_v26, %v4503_v15 }
0x224c   :  { %5629 = vrcp.f32 %v4505_v0 }
0x2256   :  { %v5630_v7 = vpop.eup %5629 }
0x2257   :  { %v4507_v2 = vmul.f32 %v5630_v7, %v5628_v51 }
0x2259   :  { %v4508_v20 = vmul.f32 %v4507_v2, %v6536_v50 }
0x225b   :  { %v4509_v34 = vsel %vm4202_vm4, %v4508_v20, 0.0 }
0x225c   :  { %v4510_v1 = vrot.slane %v4509_v34, 4 }
0x225e   :  { %v4511_v4 = vadd.f32 %v4510_v1, %v4509_v34 }
0x2260   :  { %v4512_v53 = vrot.slane %v4511_v4, 2 }
0x2262   :  { %v4513_v54 = vadd.f32 %v4512_v53, %v4511_v4 }
0x2264   :  { %v4514_v56 = vrot.slane %v4513_v54, 1 }
0x2266   :  { %v4515_v5 = vadd.f32 %v4514_v56, %v4513_v54 }
0x2268   :  { %5439 = vmatmul.mubr.msk.f32.vlgmr.msra.gmra.mrb[48].mxu1 %vm390_vm5, %v4515_v5 }
0x2289   :  { %v4662_v63 = vpop.f32.mrb[46].mxu1 }
0x228a   :  { %v5430_v10 = vpop.f32.mrb[47].mxu1 }
0x22ca   :  { %v4587_v12 = vpop.f32.mrb[46].mxu0 }
0x22cb   :  { %v4663_v22 = vadd.f32 %v4662_v63, %v4587_v12  ;;  %v5425_v50 = vpop.f32.mrb[47].mxu0 }
0x22fa   :  { %v4738_v61 = vpop.f32.mrb[48].mxu0 }
0x22fb   :  { %v4742_v14 = vadd.f32 %v4738_v61, %v4663_v22  ;;  %v5435_v16 = vpop.f32.mrb[49].mxu0 }
0x233b   :  { %v4813_v18 = vpop.f32.mrb[48].mxu1 }
0x233c   :  { %v4817_v9 = vadd.f32 %v4813_v18, %v4742_v14  ;;  %v5440_v19 = vpop.f32.mrb[49].mxu1 }
0x233e   :  { %v4819_v21 = vadd.f32 %v4818_v55, %v4817_v9 }
0x2340   :  { %v4820_v13 = vmax.f32 %v4819_v21, 0.0 }
0x2342   :  { %5446 = vmatmul.mubr.msk.f32.vlgmr.msra.gmra.mrb[50].mxu0 %vm4824_vm1, %v4820_v13 }
0x2415   :  { %v4894_v32 = vpop.f32.mrb[50].mxu0 }
0x2416   :  { %v4895_v60 = vadd.f32 %v4894_v32, %v4823_v31  ;;  %v5447_v17 = vpop.f32.mrb[51].mxu0 }
0x2418   :  { %4899 = vst.msk [vmem:[#allocation3] sm:$0x1] %vm4898_vm2, %v4895_v60 }
0x2419   :  { %5643 = shalt.err (!%p5640_p4)
}
0x241a   :  { %s5644_s25 = scalar_lea.hbm %s5949_s29, 16 }
0x241b   :  { %p5645_p5 = scmp.ne.s32.totalorder %s5949_s29, %s5644_s25  ;;  %p5648_p6 = scmp.lt.u32.totalorder %s5644_s25, %s5949_s29 }
0x241d   :  { %p5650_p7 = pnand %p5648_p6, %p5645_p5 }
0x241f   :  { %5653 = shalt.err (!%p5650_p7)
}
0x2420   :  { %4909 = dma.vmem_to_hbm [thread:$0]  %s4907_s30, 16, %s5949_s29, [#allocation4]  }
0x2421   :  { %5654 = dma.done.wait [#allocation4], 16  }
0x2422   :  { %5655 = vsyncadd [#allocation4], 4294967280 }
0x2423   :  { %4913 = vsyncpa [#allocation4], 1 }

</bundles_post_ra>
